<compile_context>
chip_gen: v6e
topology: v6e:2x2x1
jax: 0.10.0
libtpu: 0.0.40
codegen_flags: <defaults>
</compile_context>

<pallas_src>
import math
from functools import partial

import jax
import jax.numpy as jnp
from jax import lax
from jax.experimental import pallas as pl
from jax.experimental.pallas import tpu as pltpu


# ----------------------------------------------------------------------------
# Pallas kernel: fused KV decompression + flash attention, all heads per step.
# ----------------------------------------------------------------------------
def _mla_fused_kernel(q_ref, c_ref, wk_ref, bk_ref, wv_ref, bv_ref, o_ref,
                      ml_sc, acc_sc, *, num_heads, head_dim):
    """One (batch, q-tile, kv-tile) grid step.

    Ref shapes (batch dim squeezed by the BlockSpec):
      q_ref  : (TQ, H*d)    bf16, pre-scaled by 1/sqrt(d)
      c_ref  : (TK, r)      bf16 compressed KV latent tile
      wk_ref : (r, H*d)     bf16 decompress_k weight (VMEM-resident)
      bk_ref : (1, H*d)     f32  decompress_k bias
      wv_ref : (r, H*d)     bf16 decompress_v weight (VMEM-resident)
      bv_ref : (1, H*d)     f32  decompress_v bias
      o_ref  : (TQ, H*d)    lane-dense output block
      ml_sc  : (2, H, TQ, 1) f32  [0] = running max, [1] = running denominator
      acc_sc : (TQ, H*d)    f32  lane-dense running sum of p @ V
    """
    kv_idx = pl.program_id(2)
    h, d = num_heads, head_dim
    tq = q_ref.shape[0]

    @pl.when(kv_idx == 0)
    def _init():
        # -1e9 mirrors the Triton reference's running-max seed; switch to -inf
        # if additive -inf masking is ever introduced.
        ml_sc[0] = jnp.full((h, tq, 1), -1.0e9, jnp.float32)
        ml_sc[1] = jnp.zeros((h, tq, 1), jnp.float32)
        acc_sc[...] = jnp.zeros_like(acc_sc)

    # --- On-chip KV decompression: (TK, r) @ (r, H*d) on the MXU, f32 acc. ---
    c = c_ref[...]                                           # (TK, r) bf16
    k_full = (jnp.dot(c, wk_ref[...], preferred_element_type=jnp.float32)
              + bk_ref[...]).astype(jnp.bfloat16)            # (TK, H*d)
    v_full = (jnp.dot(c, wv_ref[...], preferred_element_type=jnp.float32)
              + bv_ref[...]).astype(jnp.bfloat16)            # (TK, H*d)

    q_full = q_ref[...]                                      # (TQ, H*d) bf16

    # --- Per-head online softmax on clean 2-D lane-contiguous tiles. --------
    for hh in range(h):
        sl = slice(hh * d, (hh + 1) * d)
        q_h = q_full[:, sl]                                  # (TQ, d) bf16
        k_h = k_full[:, sl]                                  # (TK, d) bf16
        v_h = v_full[:, sl]                                  # (TK, d) bf16

        # scores (TQ, TK): contract the last dim of both (q @ k^T), f32 acc.
        s = lax.dot_general(q_h, k_h, (((1,), (1,)), ((), ())),
                            preferred_element_type=jnp.float32)

        m_prev = ml_sc[0, hh]                                # (TQ, 1)
        l_prev = ml_sc[1, hh]                                # (TQ, 1)
        m_new = jnp.maximum(m_prev, jnp.max(s, axis=-1, keepdims=True))
        alpha = jnp.exp(m_prev - m_new)                      # (TQ, 1)
        p = jnp.exp(s - m_new)                               # (TQ, TK) f32

        ml_sc[1, hh] = alpha * l_prev + jnp.sum(p, axis=-1, keepdims=True)
        pv = jnp.dot(p.astype(v_h.dtype), v_h,
                     preferred_element_type=jnp.float32)     # (TQ, d)
        acc_sc[:, sl] = alpha * acc_sc[:, sl] + pv
        ml_sc[0, hh] = m_new

    @pl.when(kv_idx == pl.num_programs(2) - 1)
    def _finalize():
        # Exact reciprocal: once per q tile on (TQ,) values per head -> free.
        for hh in range(h):
            sl = slice(hh * d, (hh + 1) * d)
            inv_l = pl.reciprocal(ml_sc[1, hh], approx=False)   # (TQ, 1)
            acc_sc[:, sl] = acc_sc[:, sl] * inv_l
        # Single full-width, unmasked store of the lane-dense output block.
        o_ref[...] = acc_sc[...].astype(o_ref.dtype)


# ----------------------------------------------------------------------------
# Tile / VMEM-budget selection (generation aware).
# ----------------------------------------------------------------------------
def _vmem_limit_bytes():
    # v5e/v6e: 128 MiB VMEM per core, v7x: 64 MiB.  Keep ~25% headroom for
    # Mosaic-internal scratch; cap at 100 MiB on the big-VMEM generations.
    try:
        cap = pltpu.get_tpu_info().vmem_capacity_bytes
    except Exception:
        cap = 64 * 1024 * 1024
    return int(min(cap * 3 // 4, 100 * 1024 * 1024))


def _legal(c, dim, sub_mult):
    return 0 < c <= dim and dim % c == 0 and (c % sub_mult == 0 or c == dim)


def _options(dim, requested, cands, sub_mult=16):
    # bf16 tiles: second-to-last block dim must be a multiple of 16 (or full).
    if requested is not None and _legal(requested, dim, sub_mult):
        return [requested]
    opts = [c for c in cands if _legal(c, dim, sub_mult)]
    if dim not in opts:
        opts.append(dim)
    return opts


def _est_vmem_bytes(tq, tk, hd, r, h):
    blocks = 2 * (tq * hd * 2            # Q bf16, double buffered
                  + tk * r * 2           # compressed bf16
                  + tq * hd * 4          # output f32
                  + 2 * r * hd * 2       # wk, wv bf16
                  + 2 * hd * 4)          # biases f32
    scratch = tq * hd * 4 + 2 * h * tq * 4
    interm = (2 * tk * hd * (4 + 2)      # decompressed K/V in f32 + bf16
              + 3 * tq * tk * 4)         # per-head score / prob live values
    return int(1.5 * (blocks + scratch + interm))


def _pick_tiles(L, S, HD, R, num_heads, block_q, block_kv, vmem_limit):
    tq_opts = _options(L, block_q, (256, 128, 64, 32, 16))
    # Large KV tiles preferred (fewer grid steps, bigger DMAs); the rank-r
    # stream is tiny so TK is bounded by on-chip intermediates, not HBM.
    tk_opts = _options(S, block_kv, (2048, 1024, 512, 256, 128, 64, 32, 16))
    budget = vmem_limit // 2
    for tq in tq_opts:
        for tk in tk_opts:
            if _est_vmem_bytes(tq, tk, HD, R, num_heads) <= budget:
                return tq, tk
    return tq_opts[-1], tk_opts[-1]


# ----------------------------------------------------------------------------
# Wrapper: fused MLA attention (on-chip decompression + flash attention).
# ----------------------------------------------------------------------------
def mla_attention_pallas(Q, compressed, wk, bk, wv, bv, num_heads, *,
                         block_q=None, block_kv=None):
    """
    Args:
        Q:          (B, L, H*d)  head-packed queries (unscaled)
        compressed: (B, S, r)    low-rank KV latent cache
        wk, wv:     (r, H*d)     decompression weights
        bk, bv:     (H*d,)       decompression biases
    Returns:
        (B, L, H*d) attention output in Q.dtype.
    """
    B, L, HD = Q.shape
    S, R = compressed.shape[1], compressed.shape[2]
    head_dim = HD // num_heads
    assert head_dim * num_heads == HD

    out_dtype = Q.dtype
    scale = 1.0 / math.sqrt(head_dim)
    # Fold the softmax scale into Q in f32, fused with the bf16 convert:
    # removes H*TQ*TK VPU multiplies per kv step.
    q = (Q * scale).astype(jnp.bfloat16)
    c = compressed.astype(jnp.bfloat16)
    wk = wk.astype(jnp.bfloat16)
    wv = wv.astype(jnp.bfloat16)
    bk = bk.reshape(1, HD).astype(jnp.float32)
    bv = bv.reshape(1, HD).astype(jnp.float32)

    vmem_limit = _vmem_limit_bytes()
    TQ, TK = _pick_tiles(L, S, HD, R, num_heads, block_q, block_kv, vmem_limit)
    n_q, n_kv = L // TQ, S // TK

    kernel = partial(_mla_fused_kernel, num_heads=num_heads, head_dim=head_dim)

    return pl.pallas_call(
        kernel,
        out_shape=jax.ShapeDtypeStruct((B, L, HD), out_dtype),
        grid_spec=pltpu.PrefetchScalarGridSpec(
            num_scalar_prefetch=0,
            grid=(B, n_q, n_kv),
            in_specs=[
                pl.BlockSpec((None, TQ, HD), lambda b, i, j: (b, i, 0)),  # Q
                pl.BlockSpec((None, TK, R), lambda b, i, j: (b, j, 0)),   # c
                pl.BlockSpec((R, HD), lambda b, i, j: (0, 0)),            # wk
                pl.BlockSpec((1, HD), lambda b, i, j: (0, 0)),            # bk
                pl.BlockSpec((R, HD), lambda b, i, j: (0, 0)),            # wv
                pl.BlockSpec((1, HD), lambda b, i, j: (0, 0)),            # bv
            ],
            out_specs=pl.BlockSpec((None, TQ, HD), lambda b, i, j: (b, i, 0)),
            scratch_shapes=[
                pltpu.VMEM((2, num_heads, TQ, 1), jnp.float32),  # m / l
                pltpu.VMEM((TQ, HD), jnp.float32),               # lane-dense acc
            ],
        ),
        # B and the q-tile axis are parallel (B*n_q >= 2 keeps both v7x
        # TensorCores busy); the kv reduction axis is last and arbitrary.
        compiler_params=pltpu.CompilerParams(
            dimension_semantics=("parallel", "parallel", "arbitrary"),
            vmem_limit_bytes=vmem_limit,
        ),
    )(q, c, wk, bk, wv, bv)


# ----------------------------------------------------------------------------
# Module-equivalent forward (parameters held in a dict)
# ----------------------------------------------------------------------------
def _linear_init(key, in_dim, out_dim, dtype=jnp.float32):
    """nn.Linear-style uniform(-1/sqrt(in), 1/sqrt(in)) init."""
    kw, kb = jax.random.split(key)
    bound = 1.0 / math.sqrt(in_dim)
    w = jax.random.uniform(kw, (out_dim, in_dim), dtype, -bound, bound)
    b = jax.random.uniform(kb, (out_dim,), dtype, -bound, bound)
    return w, b


def init_mla_params(key, input_dim, latent_dim, num_heads, latent_rank):
    head_dim = latent_dim // num_heads
    assert head_dim * num_heads == latent_dim
    keys = jax.random.split(key, 5)
    return {
        "query_proj": _linear_init(keys[0], latent_dim, latent_dim),
        "compress": _linear_init(keys[1], input_dim, latent_rank),
        "decompress_k": _linear_init(keys[2], latent_rank, latent_dim),
        "decompress_v": _linear_init(keys[3], latent_rank, latent_dim),
        "out_proj": _linear_init(keys[4], latent_dim, latent_dim),
    }


def _apply_linear(x, wb):
    w, b = wb
    return jnp.dot(x, w.T) + b


def mla_forward(params, latent, x, num_heads, *, block_q=None, block_kv=None):
    """
    Args:
        latent: (B, L_latent, latent_dim)
        x:      (B, S, input_dim)
    Returns:
        (output, None) where output is (B, L_latent, latent_dim)
    """
    Q = _apply_linear(latent, params["query_proj"])          # (B, L, H*d)
    compressed = _apply_linear(x, params["compress"])        # (B, S, r)

    # K/V are never materialized in HBM: decompression happens inside the
    # kernel against the streamed rank-r cache.
    wk, bk = params["decompress_k"]                          # (H*d, r), (H*d,)
    wv, bv = params["decompress_v"]
    attn = mla_attention_pallas(Q, compressed, wk.T, bk, wv.T, bv, num_heads,
                                block_q=block_q, block_kv=block_kv)

    output = _apply_linear(attn, params["out_proj"])
    # dropout (p=0.0 / eval) is identity.
    return output, None


# ----------------------------------------------------------------------------
# Main
# ----------------------------------------------------------------------------
if __name__ == "__main__":
    B = 2
    L_latent = 32
    S = 64
    input_dim = 16
    latent_dim = 32
    num_heads = 4
    latent_rank = 8

    key = jax.random.PRNGKey(0)
    k_params, k_latent, k_x = jax.random.split(key, 3)

    params = init_mla_params(k_params, input_dim, latent_dim, num_heads, latent_rank)
    latent = jax.random.normal(k_latent, (B, L_latent, latent_dim), jnp.float32)
    x = jax.random.normal(k_x, (B, S, input_dim), jnp.float32)

    # 16 / 32 tiles (bf16-legal sublane multiples) force 2 query x 2 kv tiles
    # so the online-softmax accumulation path is exercised at toy shapes.
    out, attn_weights = mla_forward(params, latent, x, num_heads,
                                    block_q=16, block_kv=32)
    out = jax.block_until_ready(out)

    # Pure-JAX f32 reference of the whole forward pass.
    def ref_forward(params, latent, x):
        head_dim = latent_dim // num_heads
        Bq, Lq, _ = latent.shape
        Sq = x.shape[1]
        Q = _apply_linear(latent, params["query_proj"])
        c = _apply_linear(x, params["compress"])
        K = _apply_linear(c, params["decompress_k"]).reshape(
            Bq, Sq, num_heads, head_dim).transpose(0, 2, 1, 3)
        V = _apply_linear(c, params["decompress_v"]).reshape(
            Bq, Sq, num_heads, head_dim).transpose(0, 2, 1, 3)
        Qh = Q.reshape(Bq, Lq, num_heads, head_dim).transpose(0, 2, 1, 3)
        scores = jnp.einsum("bhld,bhsd->bhls", Qh, K) / jnp.sqrt(jnp.float32(head_dim))
        p = jax.nn.softmax(scores, axis=-1)
        a = jnp.einsum("bhls,bhsd->bhld", p, V)
        a = a.transpose(0, 2, 1, 3).reshape(Bq, Lq, latent_dim)
        return _apply_linear(a, params["out_proj"])

    ref = ref_forward(params, latent, x)
    # Tolerance covers the bf16 MXU operands (f32 accumulation throughout).
    assert jnp.allclose(out, ref, atol=2e-2, rtol=2e-2), "mismatch vs reference"

    print("KERNEL_OK")
</pallas_src>

<mosaic_0001>
module attributes {stable_mosaic.version = 11 : i64} {
  func.func @_mla_fused_kernel(%arg0: i32, %arg1: i32, %arg2: i32, %arg3: memref<1x16x32xbf16, #tpu.memory_space<vmem>>, %arg4: memref<1x32x8xbf16, #tpu.memory_space<vmem>>, %arg5: memref<8x32xbf16, #tpu.memory_space<vmem>>, %arg6: memref<1x32xf32, #tpu.memory_space<vmem>>, %arg7: memref<8x32xbf16, #tpu.memory_space<vmem>>, %arg8: memref<1x32xf32, #tpu.memory_space<vmem>>, %arg9: memref<1x16x32xf32, #tpu.memory_space<vmem>>, %arg10: memref<2x4x16x1xf32, #tpu.memory_space<vmem>>, %arg11: memref<16x32xf32, #tpu.memory_space<vmem>>) attributes {dimension_semantics = [#tpu.dimension_semantics<parallel>, #tpu.dimension_semantics<parallel>, #tpu.dimension_semantics<arbitrary>], iteration_bounds = array<i64: 2, 2, 2>, scalar_prefetch = 0 : i64, scratch_operands = 2 : i64, tpu.core_type = #tpu.core_type<tc>, window_params = [{transform_indices = @transform_0, window_bounds = array<i64: 1, 16, 32>}, {transform_indices = @transform_1, window_bounds = array<i64: 1, 32, 8>}, {pipeline_mode = #tpu.pipeline_mode<synchronous>, transform_indices = @transform_2, window_bounds = array<i64: 8, 32>}, {pipeline_mode = #tpu.pipeline_mode<synchronous>, transform_indices = @transform_3, window_bounds = array<i64: 1, 32>}, {pipeline_mode = #tpu.pipeline_mode<synchronous>, transform_indices = @transform_4, window_bounds = array<i64: 8, 32>}, {pipeline_mode = #tpu.pipeline_mode<synchronous>, transform_indices = @transform_5, window_bounds = array<i64: 1, 32>}, {transform_indices = @transform_6, window_bounds = array<i64: 1, 16, 32>}]} {
    %c0_i32 = arith.constant 0 : i32
    %0 = arith.cmpi eq, %arg2, %c0_i32 : i32
    %1 = arith.extui %0 : i1 to i32
    %c0_i32_0 = arith.constant 0 : i32
    %2 = arith.cmpi ne, %1, %c0_i32_0 : i32
    scf.if %2 {
      %cst_106 = arith.constant -1.000000e+09 : f32
      %154 = vector.broadcast %cst_106 : f32 to vector<4x16x1xf32>
      %c0_107 = arith.constant 0 : index
      %c0_108 = arith.constant 0 : index
      %c0_109 = arith.constant 0 : index
      %c0_110 = arith.constant 0 : index
      %155 = vector.load %arg10[%c0_107, %c0_108, %c0_109, %c0_110] : memref<2x4x16x1xf32, #tpu.memory_space<vmem>>, vector<1x4x16x1xf32>
      %156 = vector.shape_cast %155 : vector<1x4x16x1xf32> to vector<4x16x1xf32>
      %157 = vector.shape_cast %154 : vector<4x16x1xf32> to vector<1x4x16x1xf32>
      tpu.vector_store %arg10[%c0_107, %c0_108, %c0_109, %c0_110], %157 {strides = array<i32>} : memref<2x4x16x1xf32, #tpu.memory_space<vmem>>, vector<1x4x16x1xf32>,
      %cst_111 = arith.constant 0.000000e+00 : f32
      %158 = vector.broadcast %cst_111 : f32 to vector<4x16x1xf32>
      %c1_112 = arith.constant 1 : index
      %c0_113 = arith.constant 0 : index
      %c0_114 = arith.constant 0 : index
      %c0_115 = arith.constant 0 : index
      %159 = vector.load %arg10[%c1_112, %c0_113, %c0_114, %c0_115] : memref<2x4x16x1xf32, #tpu.memory_space<vmem>>, vector<1x4x16x1xf32>
      %160 = vector.shape_cast %159 : vector<1x4x16x1xf32> to vector<4x16x1xf32>
      %161 = vector.shape_cast %158 : vector<4x16x1xf32> to vector<1x4x16x1xf32>
      tpu.vector_store %arg10[%c1_112, %c0_113, %c0_114, %c0_115], %161 {strides = array<i32>} : memref<2x4x16x1xf32, #tpu.memory_space<vmem>>, vector<1x4x16x1xf32>,
      %cst_116 = arith.constant 0.000000e+00 : f32
      %162 = vector.broadcast %cst_116 : f32 to vector<16x32xf32>
      %c0_117 = arith.constant 0 : index
      %c0_118 = arith.constant 0 : index
      %163 = vector.load %arg11[%c0_117, %c0_118] : memref<16x32xf32, #tpu.memory_space<vmem>>, vector<16x32xf32>
      tpu.vector_store %arg11[%c0_117, %c0_118], %162 {strides = array<i32>} : memref<16x32xf32, #tpu.memory_space<vmem>>, vector<16x32xf32>,
    } else {
    }
    %c0 = arith.constant 0 : index
    %c0_1 = arith.constant 0 : index
    %c0_2 = arith.constant 0 : index
    %3 = vector.load %arg4[%c0, %c0_1, %c0_2] : memref<1x32x8xbf16, #tpu.memory_space<vmem>>, vector<1x32x8xbf16>
    %4 = vector.shape_cast %3 : vector<1x32x8xbf16> to vector<32x8xbf16>
    %c0_3 = arith.constant 0 : index
    %c0_4 = arith.constant 0 : index
    %5 = vector.load %arg5[%c0_3, %c0_4] : memref<8x32xbf16, #tpu.memory_space<vmem>>, vector<8x32xbf16>
    %cst = arith.constant dense<0.000000e+00> : vector<32x32xf32>
    %6 = tpu.matmul %4, %5, %cst {dimension_numbers = #tpu.dot_dimension_numbers<[1], [0], [0], [1], [0, 0, 1, 1], [], []>} : vector<32x8xbf16>, vector<8x32xbf16>, vector<32x32xf32> -> vector<32x32xf32>
    %c0_5 = arith.constant 0 : index
    %c0_6 = arith.constant 0 : index
    %7 = vector.load %arg6[%c0_5, %c0_6] : memref<1x32xf32, #tpu.memory_space<vmem>>, vector<1x32xf32>
    %8 = vector.broadcast %7 : vector<1x32xf32> to vector<32x32xf32>
    %9 = arith.addf %6, %8 : vector<32x32xf32>
    %10 = arith.truncf %9 : vector<32x32xf32> to vector<32x32xbf16>
    %c0_7 = arith.constant 0 : index
    %c0_8 = arith.constant 0 : index
    %11 = vector.load %arg7[%c0_7, %c0_8] : memref<8x32xbf16, #tpu.memory_space<vmem>>, vector<8x32xbf16>
    %cst_9 = arith.constant dense<0.000000e+00> : vector<32x32xf32>
    %12 = tpu.matmul %4, %11, %cst_9 {dimension_numbers = #tpu.dot_dimension_numbers<[1], [0], [0], [1], [0, 0, 1, 1], [], []>} : vector<32x8xbf16>, vector<8x32xbf16>, vector<32x32xf32> -> vector<32x32xf32>
    %c0_10 = arith.constant 0 : index
    %c0_11 = arith.constant 0 : index
    %13 = vector.load %arg8[%c0_10, %c0_11] : memref<1x32xf32, #tpu.memory_space<vmem>>, vector<1x32xf32>
    %14 = vector.broadcast %13 : vector<1x32xf32> to vector<32x32xf32>
    %15 = arith.addf %12, %14 : vector<32x32xf32>
    %16 = arith.truncf %15 : vector<32x32xf32> to vector<32x32xbf16>
    %c0_12 = arith.constant 0 : index
    %c0_13 = arith.constant 0 : index
    %c0_14 = arith.constant 0 : index
    %17 = vector.load %arg3[%c0_12, %c0_13, %c0_14] : memref<1x16x32xbf16, #tpu.memory_space<vmem>>, vector<1x16x32xbf16>
    %18 = vector.shape_cast %17 : vector<1x16x32xbf16> to vector<16x32xbf16>
    %19 = vector.extract_strided_slice %18 {offsets = [0, 0], sizes = [16, 8], strides = [1, 1]} : vector<16x32xbf16> to vector<16x8xbf16>
    %20 = vector.extract_strided_slice %10 {offsets = [0, 0], sizes = [32, 8], strides = [1, 1]} : vector<32x32xbf16> to vector<32x8xbf16>
    %21 = vector.extract_strided_slice %16 {offsets = [0, 0], sizes = [32, 8], strides = [1, 1]} : vector<32x32xbf16> to vector<32x8xbf16>
    %cst_15 = arith.constant dense<0.000000e+00> : vector<16x32xf32>
    %22 = tpu.matmul %19, %20, %cst_15 {dimension_numbers = #tpu.dot_dimension_numbers<[1], [1], [0], [0], [0, 0, 1, 0], [], []>} : vector<16x8xbf16>, vector<32x8xbf16>, vector<16x32xf32> -> vector<16x32xf32>
    %c0_16 = arith.constant 0 : index
    %c0_17 = arith.constant 0 : index
    %c0_18 = arith.constant 0 : index
    %c0_19 = arith.constant 0 : index
    %23 = vector.load %arg10[%c0_16, %c0_17, %c0_18, %c0_19] : memref<2x4x16x1xf32, #tpu.memory_space<vmem>>, vector<1x1x16x1xf32>
    %24 = vector.shape_cast %23 : vector<1x1x16x1xf32> to vector<16x1xf32>
    %c1 = arith.constant 1 : index
    %c0_20 = arith.constant 0 : index
    %c0_21 = arith.constant 0 : index
    %c0_22 = arith.constant 0 : index
    %25 = vector.load %arg10[%c1, %c0_20, %c0_21, %c0_22] : memref<2x4x16x1xf32, #tpu.memory_space<vmem>>, vector<1x1x16x1xf32>
    %26 = vector.shape_cast %25 : vector<1x1x16x1xf32> to vector<16x1xf32>
    %cst_23 = arith.constant dense<0xFF800000> : vector<16xf32>
    %27 = vector.multi_reduction <maximumf>, %22, %cst_23 [1] : vector<16x32xf32> to vector<16xf32>
    %28 = vector.shape_cast %27 : vector<16xf32> to vector<16x1xf32>
    %29 = arith.maximumf %24, %28 : vector<16x1xf32>
    %30 = arith.subf %24, %29 : vector<16x1xf32>
    %31 = math.exp %30 : vector<16x1xf32>
    %32 = vector.broadcast %29 : vector<16x1xf32> to vector<16x32xf32>
    %33 = arith.subf %22, %32 : vector<16x32xf32>
    %34 = math.exp %33 : vector<16x32xf32>
    %35 = arith.mulf %31, %26 : vector<16x1xf32>
    %cst_24 = arith.constant dense<0.000000e+00> : vector<16xf32>
    %36 = vector.multi_reduction <add>, %34, %cst_24 [1] : vector<16x32xf32> to vector<16xf32>
    %37 = vector.shape_cast %36 : vector<16xf32> to vector<16x1xf32>
    %38 = arith.addf %35, %37 : vector<16x1xf32>
    %c1_25 = arith.constant 1 : index
    %c0_26 = arith.constant 0 : index
    %c0_27 = arith.constant 0 : index
    %c0_28 = arith.constant 0 : index
    %39 = vector.load %arg10[%c1_25, %c0_26, %c0_27, %c0_28] : memref<2x4x16x1xf32, #tpu.memory_space<vmem>>, vector<1x1x16x1xf32>
    %40 = vector.shape_cast %39 : vector<1x1x16x1xf32> to vector<16x1xf32>
    %41 = vector.shape_cast %38 : vector<16x1xf32> to vector<1x1x16x1xf32>
    tpu.vector_store %arg10[%c1_25, %c0_26, %c0_27, %c0_28], %41 {strides = array<i32>} : memref<2x4x16x1xf32, #tpu.memory_space<vmem>>, vector<1x1x16x1xf32>,
    %42 = arith.truncf %34 : vector<16x32xf32> to vector<16x32xbf16>
    %cst_29 = arith.constant dense<0.000000e+00> : vector<16x8xf32>
    %43 = tpu.matmul %42, %21, %cst_29 {dimension_numbers = #tpu.dot_dimension_numbers<[1], [0], [0], [1], [0, 0, 1, 1], [], []>} : vector<16x32xbf16>, vector<32x8xbf16>, vector<16x8xf32> -> vector<16x8xf32>
    %c0_30 = arith.constant 0 : index
    %c0_31 = arith.constant 0 : index
    %44 = vector.load %arg11[%c0_30, %c0_31] : memref<16x32xf32, #tpu.memory_space<vmem>>, vector<16x8xf32>
    %45 = vector.broadcast %31 : vector<16x1xf32> to vector<16x8xf32>
    %46 = arith.mulf %45, %44 : vector<16x8xf32>
    %47 = arith.addf %46, %43 : vector<16x8xf32>
    %c0_32 = arith.constant 0 : index
    %c0_33 = arith.constant 0 : index
    %48 = vector.load %arg11[%c0_32, %c0_33] : memref<16x32xf32, #tpu.memory_space<vmem>>, vector<16x8xf32>
    tpu.vector_store %arg11[%c0_32, %c0_33], %47 {strides = array<i32>} : memref<16x32xf32, #tpu.memory_space<vmem>>, vector<16x8xf32>,
    %c0_34 = arith.constant 0 : index
    %c0_35 = arith.constant 0 : index
    %c0_36 = arith.constant 0 : index
    %c0_37 = arith.constant 0 : index
    %49 = vector.load %arg10[%c0_34, %c0_35, %c0_36, %c0_37] : memref<2x4x16x1xf32, #tpu.memory_space<vmem>>, vector<1x1x16x1xf32>
    %50 = vector.shape_cast %49 : vector<1x1x16x1xf32> to vector<16x1xf32>
    %51 = vector.shape_cast %29 : vector<16x1xf32> to vector<1x1x16x1xf32>
    tpu.vector_store %arg10[%c0_34, %c0_35, %c0_36, %c0_37], %51 {strides = array<i32>} : memref<2x4x16x1xf32, #tpu.memory_space<vmem>>, vector<1x1x16x1xf32>,
    %52 = vector.extract_strided_slice %18 {offsets = [0, 8], sizes = [16, 8], strides = [1, 1]} : vector<16x32xbf16> to vector<16x8xbf16>
    %53 = vector.extract_strided_slice %10 {offsets = [0, 8], sizes = [32, 8], strides = [1, 1]} : vector<32x32xbf16> to vector<32x8xbf16>
    %54 = vector.extract_strided_slice %16 {offsets = [0, 8], sizes = [32, 8], strides = [1, 1]} : vector<32x32xbf16> to vector<32x8xbf16>
    %cst_38 = arith.constant dense<0.000000e+00> : vector<16x32xf32>
    %55 = tpu.matmul %52, %53, %cst_38 {dimension_numbers = #tpu.dot_dimension_numbers<[1], [1], [0], [0], [0, 0, 1, 0], [], []>} : vector<16x8xbf16>, vector<32x8xbf16>, vector<16x32xf32> -> vector<16x32xf32>
    %c0_39 = arith.constant 0 : index
    %c1_40 = arith.constant 1 : index
    %c0_41 = arith.constant 0 : index
    %c0_42 = arith.constant 0 : index
    %56 = vector.load %arg10[%c0_39, %c1_40, %c0_41, %c0_42] : memref<2x4x16x1xf32, #tpu.memory_space<vmem>>, vector<1x1x16x1xf32>
    %57 = vector.shape_cast %56 : vector<1x1x16x1xf32> to vector<16x1xf32>
    %c1_43 = arith.constant 1 : index
    %c1_44 = arith.constant 1 : index
    %c0_45 = arith.constant 0 : index
    %c0_46 = arith.constant 0 : index
    %58 = vector.load %arg10[%c1_43, %c1_44, %c0_45, %c0_46] : memref<2x4x16x1xf32, #tpu.memory_space<vmem>>, vector<1x1x16x1xf32>
    %59 = vector.shape_cast %58 : vector<1x1x16x1xf32> to vector<16x1xf32>
    %cst_47 = arith.constant dense<0xFF800000> : vector<16xf32>
    %60 = vector.multi_reduction <maximumf>, %55, %cst_47 [1] : vector<16x32xf32> to vector<16xf32>
    %61 = vector.shape_cast %60 : vector<16xf32> to vector<16x1xf32>
    %62 = arith.maximumf %57, %61 : vector<16x1xf32>
    %63 = arith.subf %57, %62 : vector<16x1xf32>
    %64 = math.exp %63 : vector<16x1xf32>
    %65 = vector.broadcast %62 : vector<16x1xf32> to vector<16x32xf32>
    %66 = arith.subf %55, %65 : vector<16x32xf32>
    %67 = math.exp %66 : vector<16x32xf32>
    %68 = arith.mulf %64, %59 : vector<16x1xf32>
    %cst_48 = arith.constant dense<0.000000e+00> : vector<16xf32>
    %69 = vector.multi_reduction <add>, %67, %cst_48 [1] : vector<16x32xf32> to vector<16xf32>
    %70 = vector.shape_cast %69 : vector<16xf32> to vector<16x1xf32>
    %71 = arith.addf %68, %70 : vector<16x1xf32>
    %c1_49 = arith.constant 1 : index
    %c1_50 = arith.constant 1 : index
    %c0_51 = arith.constant 0 : index
    %c0_52 = arith.constant 0 : index
    %72 = vector.load %arg10[%c1_49, %c1_50, %c0_51, %c0_52] : memref<2x4x16x1xf32, #tpu.memory_space<vmem>>, vector<1x1x16x1xf32>
    %73 = vector.shape_cast %72 : vector<1x1x16x1xf32> to vector<16x1xf32>
    %74 = vector.shape_cast %71 : vector<16x1xf32> to vector<1x1x16x1xf32>
    tpu.vector_store %arg10[%c1_49, %c1_50, %c0_51, %c0_52], %74 {strides = array<i32>} : memref<2x4x16x1xf32, #tpu.memory_space<vmem>>, vector<1x1x16x1xf32>,
    %75 = arith.truncf %67 : vector<16x32xf32> to vector<16x32xbf16>
    %cst_53 = arith.constant dense<0.000000e+00> : vector<16x8xf32>
    %76 = tpu.matmul %75, %54, %cst_53 {dimension_numbers = #tpu.dot_dimension_numbers<[1], [0], [0], [1], [0, 0, 1, 1], [], []>} : vector<16x32xbf16>, vector<32x8xbf16>, vector<16x8xf32> -> vector<16x8xf32>
    %c0_54 = arith.constant 0 : index
    %c8 = arith.constant 8 : index
    %77 = vector.load %arg11[%c0_54, %c8] : memref<16x32xf32, #tpu.memory_space<vmem>>, vector<16x8xf32>
    %78 = vector.broadcast %64 : vector<16x1xf32> to vector<16x8xf32>
    %79 = arith.mulf %78, %77 : vector<16x8xf32>
    %80 = arith.addf %79, %76 : vector<16x8xf32>
    %c0_55 = arith.constant 0 : index
    %c8_56 = arith.constant 8 : index
    %81 = vector.load %arg11[%c0_55, %c8_56] : memref<16x32xf32, #tpu.memory_space<vmem>>, vector<16x8xf32>
    tpu.vector_store %arg11[%c0_55, %c8_56], %80 {strides = array<i32>} : memref<16x32xf32, #tpu.memory_space<vmem>>, vector<16x8xf32>,
    %c0_57 = arith.constant 0 : index
    %c1_58 = arith.constant 1 : index
    %c0_59 = arith.constant 0 : index
    %c0_60 = arith.constant 0 : index
    %82 = vector.load %arg10[%c0_57, %c1_58, %c0_59, %c0_60] : memref<2x4x16x1xf32, #tpu.memory_space<vmem>>, vector<1x1x16x1xf32>
    %83 = vector.shape_cast %82 : vector<1x1x16x1xf32> to vector<16x1xf32>
    %84 = vector.shape_cast %62 : vector<16x1xf32> to vector<1x1x16x1xf32>
    tpu.vector_store %arg10[%c0_57, %c1_58, %c0_59, %c0_60], %84 {strides = array<i32>} : memref<2x4x16x1xf32, #tpu.memory_space<vmem>>, vector<1x1x16x1xf32>,
    %85 = vector.extract_strided_slice %18 {offsets = [0, 16], sizes = [16, 8], strides = [1, 1]} : vector<16x32xbf16> to vector<16x8xbf16>
    %86 = vector.extract_strided_slice %10 {offsets = [0, 16], sizes = [32, 8], strides = [1, 1]} : vector<32x32xbf16> to vector<32x8xbf16>
    %87 = vector.extract_strided_slice %16 {offsets = [0, 16], sizes = [32, 8], strides = [1, 1]} : vector<32x32xbf16> to vector<32x8xbf16>
    %cst_61 = arith.constant dense<0.000000e+00> : vector<16x32xf32>
    %88 = tpu.matmul %85, %86, %cst_61 {dimension_numbers = #tpu.dot_dimension_numbers<[1], [1], [0], [0], [0, 0, 1, 0], [], []>} : vector<16x8xbf16>, vector<32x8xbf16>, vector<16x32xf32> -> vector<16x32xf32>
    %c0_62 = arith.constant 0 : index
    %c2 = arith.constant 2 : index
    %c0_63 = arith.constant 0 : index
    %c0_64 = arith.constant 0 : index
    %89 = vector.load %arg10[%c0_62, %c2, %c0_63, %c0_64] : memref<2x4x16x1xf32, #tpu.memory_space<vmem>>, vector<1x1x16x1xf32>
    %90 = vector.shape_cast %89 : vector<1x1x16x1xf32> to vector<16x1xf32>
    %c1_65 = arith.constant 1 : index
    %c2_66 = arith.constant 2 : index
    %c0_67 = arith.constant 0 : index
    %c0_68 = arith.constant 0 : index
    %91 = vector.load %arg10[%c1_65, %c2_66, %c0_67, %c0_68] : memref<2x4x16x1xf32, #tpu.memory_space<vmem>>, vector<1x1x16x1xf32>
    %92 = vector.shape_cast %91 : vector<1x1x16x1xf32> to vector<16x1xf32>
    %cst_69 = arith.constant dense<0xFF800000> : vector<16xf32>
    %93 = vector.multi_reduction <maximumf>, %88, %cst_69 [1] : vector<16x32xf32> to vector<16xf32>
    %94 = vector.shape_cast %93 : vector<16xf32> to vector<16x1xf32>
    %95 = arith.maximumf %90, %94 : vector<16x1xf32>
    %96 = arith.subf %90, %95 : vector<16x1xf32>
    %97 = math.exp %96 : vector<16x1xf32>
    %98 = vector.broadcast %95 : vector<16x1xf32> to vector<16x32xf32>
    %99 = arith.subf %88, %98 : vector<16x32xf32>
    %100 = math.exp %99 : vector<16x32xf32>
    %101 = arith.mulf %97, %92 : vector<16x1xf32>
    %cst_70 = arith.constant dense<0.000000e+00> : vector<16xf32>
    %102 = vector.multi_reduction <add>, %100, %cst_70 [1] : vector<16x32xf32> to vector<16xf32>
    %103 = vector.shape_cast %102 : vector<16xf32> to vector<16x1xf32>
    %104 = arith.addf %101, %103 : vector<16x1xf32>
    %c1_71 = arith.constant 1 : index
    %c2_72 = arith.constant 2 : index
    %c0_73 = arith.constant 0 : index
    %c0_74 = arith.constant 0 : index
    %105 = vector.load %arg10[%c1_71, %c2_72, %c0_73, %c0_74] : memref<2x4x16x1xf32, #tpu.memory_space<vmem>>, vector<1x1x16x1xf32>
    %106 = vector.shape_cast %105 : vector<1x1x16x1xf32> to vector<16x1xf32>
    %107 = vector.shape_cast %104 : vector<16x1xf32> to vector<1x1x16x1xf32>
    tpu.vector_store %arg10[%c1_71, %c2_72, %c0_73, %c0_74], %107 {strides = array<i32>} : memref<2x4x16x1xf32, #tpu.memory_space<vmem>>, vector<1x1x16x1xf32>,
    %108 = arith.truncf %100 : vector<16x32xf32> to vector<16x32xbf16>
    %cst_75 = arith.constant dense<0.000000e+00> : vector<16x8xf32>
    %109 = tpu.matmul %108, %87, %cst_75 {dimension_numbers = #tpu.dot_dimension_numbers<[1], [0], [0], [1], [0, 0, 1, 1], [], []>} : vector<16x32xbf16>, vector<32x8xbf16>, vector<16x8xf32> -> vector<16x8xf32>
    %c0_76 = arith.constant 0 : index
    %c16 = arith.constant 16 : index
    %110 = vector.load %arg11[%c0_76, %c16] : memref<16x32xf32, #tpu.memory_space<vmem>>, vector<16x8xf32>
    %111 = vector.broadcast %97 : vector<16x1xf32> to vector<16x8xf32>
    %112 = arith.mulf %111, %110 : vector<16x8xf32>
    %113 = arith.addf %112, %109 : vector<16x8xf32>
    %c0_77 = arith.constant 0 : index
    %c16_78 = arith.constant 16 : index
    %114 = vector.load %arg11[%c0_77, %c16_78] : memref<16x32xf32, #tpu.memory_space<vmem>>, vector<16x8xf32>
    tpu.vector_store %arg11[%c0_77, %c16_78], %113 {strides = array<i32>} : memref<16x32xf32, #tpu.memory_space<vmem>>, vector<16x8xf32>,
    %c0_79 = arith.constant 0 : index
    %c2_80 = arith.constant 2 : index
    %c0_81 = arith.constant 0 : index
    %c0_82 = arith.constant 0 : index
    %115 = vector.load %arg10[%c0_79, %c2_80, %c0_81, %c0_82] : memref<2x4x16x1xf32, #tpu.memory_space<vmem>>, vector<1x1x16x1xf32>
    %116 = vector.shape_cast %115 : vector<1x1x16x1xf32> to vector<16x1xf32>
    %117 = vector.shape_cast %95 : vector<16x1xf32> to vector<1x1x16x1xf32>
    tpu.vector_store %arg10[%c0_79, %c2_80, %c0_81, %c0_82], %117 {strides = array<i32>} : memref<2x4x16x1xf32, #tpu.memory_space<vmem>>, vector<1x1x16x1xf32>,
    %118 = vector.extract_strided_slice %18 {offsets = [0, 24], sizes = [16, 8], strides = [1, 1]} : vector<16x32xbf16> to vector<16x8xbf16>
    %119 = vector.extract_strided_slice %10 {offsets = [0, 24], sizes = [32, 8], strides = [1, 1]} : vector<32x32xbf16> to vector<32x8xbf16>
    %120 = vector.extract_strided_slice %16 {offsets = [0, 24], sizes = [32, 8], strides = [1, 1]} : vector<32x32xbf16> to vector<32x8xbf16>
    %cst_83 = arith.constant dense<0.000000e+00> : vector<16x32xf32>
    %121 = tpu.matmul %118, %119, %cst_83 {dimension_numbers = #tpu.dot_dimension_numbers<[1], [1], [0], [0], [0, 0, 1, 0], [], []>} : vector<16x8xbf16>, vector<32x8xbf16>, vector<16x32xf32> -> vector<16x32xf32>
    %c0_84 = arith.constant 0 : index
    %c3 = arith.constant 3 : index
    %c0_85 = arith.constant 0 : index
    %c0_86 = arith.constant 0 : index
    %122 = vector.load %arg10[%c0_84, %c3, %c0_85, %c0_86] : memref<2x4x16x1xf32, #tpu.memory_space<vmem>>, vector<1x1x16x1xf32>
    %123 = vector.shape_cast %122 : vector<1x1x16x1xf32> to vector<16x1xf32>
    %c1_87 = arith.constant 1 : index
    %c3_88 = arith.constant 3 : index
    %c0_89 = arith.constant 0 : index
    %c0_90 = arith.constant 0 : index
    %124 = vector.load %arg10[%c1_87, %c3_88, %c0_89, %c0_90] : memref<2x4x16x1xf32, #tpu.memory_space<vmem>>, vector<1x1x16x1xf32>
    %125 = vector.shape_cast %124 : vector<1x1x16x1xf32> to vector<16x1xf32>
    %cst_91 = arith.constant dense<0xFF800000> : vector<16xf32>
    %126 = vector.multi_reduction <maximumf>, %121, %cst_91 [1] : vector<16x32xf32> to vector<16xf32>
    %127 = vector.shape_cast %126 : vector<16xf32> to vector<16x1xf32>
    %128 = arith.maximumf %123, %127 : vector<16x1xf32>
    %129 = arith.subf %123, %128 : vector<16x1xf32>
    %130 = math.exp %129 : vector<16x1xf32>
    %131 = vector.broadcast %128 : vector<16x1xf32> to vector<16x32xf32>
    %132 = arith.subf %121, %131 : vector<16x32xf32>
    %133 = math.exp %132 : vector<16x32xf32>
    %134 = arith.mulf %130, %125 : vector<16x1xf32>
    %cst_92 = arith.constant dense<0.000000e+00> : vector<16xf32>
    %135 = vector.multi_reduction <add>, %133, %cst_92 [1] : vector<16x32xf32> to vector<16xf32>
    %136 = vector.shape_cast %135 : vector<16xf32> to vector<16x1xf32>
    %137 = arith.addf %134, %136 : vector<16x1xf32>
    %c1_93 = arith.constant 1 : index
    %c3_94 = arith.constant 3 : index
    %c0_95 = arith.constant 0 : index
    %c0_96 = arith.constant 0 : index
    %138 = vector.load %arg10[%c1_93, %c3_94, %c0_95, %c0_96] : memref<2x4x16x1xf32, #tpu.memory_space<vmem>>, vector<1x1x16x1xf32>
    %139 = vector.shape_cast %138 : vector<1x1x16x1xf32> to vector<16x1xf32>
    %140 = vector.shape_cast %137 : vector<16x1xf32> to vector<1x1x16x1xf32>
    tpu.vector_store %arg10[%c1_93, %c3_94, %c0_95, %c0_96], %140 {strides = array<i32>} : memref<2x4x16x1xf32, #tpu.memory_space<vmem>>, vector<1x1x16x1xf32>,
    %141 = arith.truncf %133 : vector<16x32xf32> to vector<16x32xbf16>
    %cst_97 = arith.constant dense<0.000000e+00> : vector<16x8xf32>
    %142 = tpu.matmul %141, %120, %cst_97 {dimension_numbers = #tpu.dot_dimension_numbers<[1], [0], [0], [1], [0, 0, 1, 1], [], []>} : vector<16x32xbf16>, vector<32x8xbf16>, vector<16x8xf32> -> vector<16x8xf32>
    %c0_98 = arith.constant 0 : index
    %c24 = arith.constant 24 : index
    %143 = vector.load %arg11[%c0_98, %c24] : memref<16x32xf32, #tpu.memory_space<vmem>>, vector<16x8xf32>
    %144 = vector.broadcast %130 : vector<16x1xf32> to vector<16x8xf32>
    %145 = arith.mulf %144, %143 : vector<16x8xf32>
    %146 = arith.addf %145, %142 : vector<16x8xf32>
    %c0_99 = arith.constant 0 : index
    %c24_100 = arith.constant 24 : index
    %147 = vector.load %arg11[%c0_99, %c24_100] : memref<16x32xf32, #tpu.memory_space<vmem>>, vector<16x8xf32>
    tpu.vector_store %arg11[%c0_99, %c24_100], %146 {strides = array<i32>} : memref<16x32xf32, #tpu.memory_space<vmem>>, vector<16x8xf32>,
    %c0_101 = arith.constant 0 : index
    %c3_102 = arith.constant 3 : index
    %c0_103 = arith.constant 0 : index
    %c0_104 = arith.constant 0 : index
    %148 = vector.load %arg10[%c0_101, %c3_102, %c0_103, %c0_104] : memref<2x4x16x1xf32, #tpu.memory_space<vmem>>, vector<1x1x16x1xf32>
    %149 = vector.shape_cast %148 : vector<1x1x16x1xf32> to vector<16x1xf32>
    %150 = vector.shape_cast %128 : vector<16x1xf32> to vector<1x1x16x1xf32>
    tpu.vector_store %arg10[%c0_101, %c3_102, %c0_103, %c0_104], %150 {strides = array<i32>} : memref<2x4x16x1xf32, #tpu.memory_space<vmem>>, vector<1x1x16x1xf32>,
    %c1_i32 = arith.constant 1 : i32
    %151 = arith.cmpi eq, %arg2, %c1_i32 : i32
    %152 = arith.extui %151 : i1 to i32
    %c0_i32_105 = arith.constant 0 : i32
    %153 = arith.cmpi ne, %152, %c0_i32_105 : i32
    scf.if %153 {
      %c1_106 = arith.constant 1 : index
      %c0_107 = arith.constant 0 : index
      %c0_108 = arith.constant 0 : index
      %c0_109 = arith.constant 0 : index
      %154 = vector.load %arg10[%c1_106, %c0_107, %c0_108, %c0_109] : memref<2x4x16x1xf32, #tpu.memory_space<vmem>>, vector<1x1x16x1xf32>
      %155 = vector.shape_cast %154 : vector<1x1x16x1xf32> to vector<16x1xf32>
      %156 = tpu.reciprocal %155 : vector<16x1xf32> -> vector<16x1xf32>
      %c0_110 = arith.constant 0 : index
      %c0_111 = arith.constant 0 : index
      %157 = vector.load %arg11[%c0_110, %c0_111] : memref<16x32xf32, #tpu.memory_space<vmem>>, vector<16x8xf32>
      %158 = vector.broadcast %156 : vector<16x1xf32> to vector<16x8xf32>
      %159 = arith.mulf %157, %158 : vector<16x8xf32>
      %c0_112 = arith.constant 0 : index
      %c0_113 = arith.constant 0 : index
      %160 = vector.load %arg11[%c0_112, %c0_113] : memref<16x32xf32, #tpu.memory_space<vmem>>, vector<16x8xf32>
      tpu.vector_store %arg11[%c0_112, %c0_113], %159 {strides = array<i32>} : memref<16x32xf32, #tpu.memory_space<vmem>>, vector<16x8xf32>,
      %c1_114 = arith.constant 1 : index
      %c1_115 = arith.constant 1 : index
      %c0_116 = arith.constant 0 : index
      %c0_117 = arith.constant 0 : index
      %161 = vector.load %arg10[%c1_114, %c1_115, %c0_116, %c0_117] : memref<2x4x16x1xf32, #tpu.memory_space<vmem>>, vector<1x1x16x1xf32>
      %162 = vector.shape_cast %161 : vector<1x1x16x1xf32> to vector<16x1xf32>
      %163 = tpu.reciprocal %162 : vector<16x1xf32> -> vector<16x1xf32>
      %c0_118 = arith.constant 0 : index
      %c8_119 = arith.constant 8 : index
      %164 = vector.load %arg11[%c0_118, %c8_119] : memref<16x32xf32, #tpu.memory_space<vmem>>, vector<16x8xf32>
      %165 = vector.broadcast %163 : vector<16x1xf32> to vector<16x8xf32>
      %166 = arith.mulf %164, %165 : vector<16x8xf32>
      %c0_120 = arith.constant 0 : index
      %c8_121 = arith.constant 8 : index
      %167 = vector.load %arg11[%c0_120, %c8_121] : memref<16x32xf32, #tpu.memory_space<vmem>>, vector<16x8xf32>
      tpu.vector_store %arg11[%c0_120, %c8_121], %166 {strides = array<i32>} : memref<16x32xf32, #tpu.memory_space<vmem>>, vector<16x8xf32>,
      %c1_122 = arith.constant 1 : index
      %c2_123 = arith.constant 2 : index
      %c0_124 = arith.constant 0 : index
      %c0_125 = arith.constant 0 : index
      %168 = vector.load %arg10[%c1_122, %c2_123, %c0_124, %c0_125] : memref<2x4x16x1xf32, #tpu.memory_space<vmem>>, vector<1x1x16x1xf32>
      %169 = vector.shape_cast %168 : vector<1x1x16x1xf32> to vector<16x1xf32>
      %170 = tpu.reciprocal %169 : vector<16x1xf32> -> vector<16x1xf32>
      %c0_126 = arith.constant 0 : index
      %c16_127 = arith.constant 16 : index
      %171 = vector.load %arg11[%c0_126, %c16_127] : memref<16x32xf32, #tpu.memory_space<vmem>>, vector<16x8xf32>
      %172 = vector.broadcast %170 : vector<16x1xf32> to vector<16x8xf32>
      %173 = arith.mulf %171, %172 : vector<16x8xf32>
      %c0_128 = arith.constant 0 : index
      %c16_129 = arith.constant 16 : index
      %174 = vector.load %arg11[%c0_128, %c16_129] : memref<16x32xf32, #tpu.memory_space<vmem>>, vector<16x8xf32>
      tpu.vector_store %arg11[%c0_128, %c16_129], %173 {strides = array<i32>} : memref<16x32xf32, #tpu.memory_space<vmem>>, vector<16x8xf32>,
      %c1_130 = arith.constant 1 : index
      %c3_131 = arith.constant 3 : index
      %c0_132 = arith.constant 0 : index
      %c0_133 = arith.constant 0 : index
      %175 = vector.load %arg10[%c1_130, %c3_131, %c0_132, %c0_133] : memref<2x4x16x1xf32, #tpu.memory_space<vmem>>, vector<1x1x16x1xf32>
      %176 = vector.shape_cast %175 : vector<1x1x16x1xf32> to vector<16x1xf32>
      %177 = tpu.reciprocal %176 : vector<16x1xf32> -> vector<16x1xf32>
      %c0_134 = arith.constant 0 : index
      %c24_135 = arith.constant 24 : index
      %178 = vector.load %arg11[%c0_134, %c24_135] : memref<16x32xf32, #tpu.memory_space<vmem>>, vector<16x8xf32>
      %179 = vector.broadcast %177 : vector<16x1xf32> to vector<16x8xf32>
      %180 = arith.mulf %178, %179 : vector<16x8xf32>
      %c0_136 = arith.constant 0 : index
      %c24_137 = arith.constant 24 : index
      %181 = vector.load %arg11[%c0_136, %c24_137] : memref<16x32xf32, #tpu.memory_space<vmem>>, vector<16x8xf32>
      tpu.vector_store %arg11[%c0_136, %c24_137], %180 {strides = array<i32>} : memref<16x32xf32, #tpu.memory_space<vmem>>, vector<16x8xf32>,
      %c0_138 = arith.constant 0 : index
      %c0_139 = arith.constant 0 : index
      %182 = vector.load %arg11[%c0_138, %c0_139] : memref<16x32xf32, #tpu.memory_space<vmem>>, vector<16x32xf32>
      %c0_140 = arith.constant 0 : index
      %c0_141 = arith.constant 0 : index
      %c0_142 = arith.constant 0 : index
      %183 = vector.load %arg9[%c0_140, %c0_141, %c0_142] : memref<1x16x32xf32, #tpu.memory_space<vmem>>, vector<1x16x32xf32>
      %184 = vector.shape_cast %183 : vector<1x16x32xf32> to vector<16x32xf32>
      %185 = vector.shape_cast %182 : vector<16x32xf32> to vector<1x16x32xf32>
      tpu.vector_store %arg9[%c0_140, %c0_141, %c0_142], %185 {strides = array<i32>} : memref<1x16x32xf32, #tpu.memory_space<vmem>>, vector<1x16x32xf32>,
    } else {
    }
    return
  }
  func.func @transform_0(%arg0: i32, %arg1: i32, %arg2: i32) -> (i32, i32, i32) {
    %c0_i32 = arith.constant 0 : i32
    %c0_i32_0 = arith.constant 0 : i32
    return %arg0, %arg1, %c0_i32 : i32, i32, i32
  }
  func.func @transform_1(%arg0: i32, %arg1: i32, %arg2: i32) -> (i32, i32, i32) {
    %c0_i32 = arith.constant 0 : i32
    %c0_i32_0 = arith.constant 0 : i32
    return %arg0, %arg2, %c0_i32 : i32, i32, i32
  }
  func.func @transform_2(%arg0: i32, %arg1: i32, %arg2: i32) -> (i32, i32) {
    %c0_i32 = arith.constant 0 : i32
    %c0_i32_0 = arith.constant 0 : i32
    %c0_i32_1 = arith.constant 0 : i32
    return %c0_i32, %c0_i32_0 : i32, i32
  }
  func.func @transform_3(%arg0: i32, %arg1: i32, %arg2: i32) -> (i32, i32) {
    %c0_i32 = arith.constant 0 : i32
    %c0_i32_0 = arith.constant 0 : i32
    %c0_i32_1 = arith.constant 0 : i32
    return %c0_i32, %c0_i32_0 : i32, i32
  }
  func.func @transform_4(%arg0: i32, %arg1: i32, %arg2: i32) -> (i32, i32) {
    %c0_i32 = arith.constant 0 : i32
    %c0_i32_0 = arith.constant 0 : i32
    %c0_i32_1 = arith.constant 0 : i32
    return %c0_i32, %c0_i32_0 : i32, i32
  }
  func.func @transform_5(%arg0: i32, %arg1: i32, %arg2: i32) -> (i32, i32) {
    %c0_i32 = arith.constant 0 : i32
    %c0_i32_0 = arith.constant 0 : i32
    %c0_i32_1 = arith.constant 0 : i32
    return %c0_i32, %c0_i32_0 : i32, i32
  }
  func.func @transform_6(%arg0: i32, %arg1: i32, %arg2: i32) -> (i32, i32, i32) {
    %c0_i32 = arith.constant 0 : i32
    %c0_i32_0 = arith.constant 0 : i32
    return %arg0, %arg1, %c0_i32 : i32, i32, i32
  }
}

</mosaic_0001>

<bundles_post_ra>
// kernel: tpu_custom_call.1
= control target key start
LH: loop header
LB: loop body
LE: loop exit
PB: predicated region body
PF: predicated region fallthrough
CT: control target
= control target key end

     0   :  { %11 = vsyncpa [#allocation5], 0  ;;  %s2382_s0 = inlined_call_operand.vmem [shape: bf16[2,32,32], index: 0, kind: input, shape index: {}]   ;;  %s2383_s1 = inlined_call_operand.vmem [shape: bf16[2,64,8], index: 1, kind: input, shape index: {}]   ;;  %s2384_s2 = inlined_call_operand.vmem [shape: bf16[8,32], index: 2, kind: input, shape index: {}]   ;;  %s2385_s3 = inlined_call_operand.vmem [shape: f32[1,32], index: 3, kind: input, shape index: {}]   ;;  %s2386_s4 = inlined_call_operand.vmem [shape: bf16[8,32], index: 4, kind: input, shape index: {}]   ;;  %s2387_s5 = inlined_call_operand.vmem [shape: f32[1,32], index: 5, kind: input, shape index: {}]   ;;  %s2388_s6 = inlined_call_operand.hbm [shape: f32[2,32,32], index: 6, kind: output, shape index: {}]  }
   0x1   :  { %13 = vsyncpa [#allocation5 + $0x1], 0  ;;  %s1892_s21 = smov 0   ;;  %s1894_s22 = smov 0  }
   0x2   :  { %s1896_s23 = smov 0   ;;  %s1898_s24 = smov 0  }
   0x3   :  { %s1900_s25 = smov 0   ;;  %s1902_s26 = smov 0  }
   0x4   :  { %s1904_s27 = smov 0   ;;  %s1906_s28 = smov 0  }
   0x5   :  { %s1908_s29 = smov 0   ;;  %s1910_s30 = smov 0  }
   0x6 LB: > { %2397 = sst [smem:[#allocation7_spill]] %s1813_s23  ;;  %s1433_s7 = sadd.s32 4294967295, %s1841_s30   ;;  %s1841_s30 = sphi %s1910_s30, %s19_s30   ;;  %s1837_s29 = sphi %s1908_s29, %s2417_s29   ;;  %s1833_s28 = sphi %s1906_s28, %s2416_s28   ;;  %s1829_s27 = sphi %s1904_s27, %s2415_s27   ;;  %s1825_s26 = sphi %s1902_s26, %s2414_s26   ;;  %s1821_s25 = sphi %s1900_s25, %s2413_s25   ;;  %s1817_s24 = sphi %s1898_s24, %s2412_s24   ;;  %s1813_s23 = sphi %s1896_s23, %s2411_s23   ;;  %s1809_s22 = sphi %s1894_s22, %s2419_s22   ;;  %s1805_s21 = sphi %s1892_s21, %s2418_s21  }
   0x7   : > { %2398 = sst [smem:[#allocation8_spill]] %s1829_s27  ;;  %s1434_s8 = sadd.s32 4294967294, %s1841_s30  }
   0x8   : > { %2399 = sst [smem:[#allocation9_spill]] %s1833_s28  ;;  %s31_s9 = sadd.s32 1, %s1829_s27 }
   0x9   : > { %2400 = sst [smem:[#allocation10_spill]] %s1837_s29  ;;  %p32_p0 = scmp.ge.s32.totalorder %s31_s9, 2 }
   0xa   : > { %s34_s10 = sadd.s32 1, %s1833_s28  ;;  %s38_s11 = sadd.s32 1, %s1837_s29 }
   0xb   : > { %p197_p1 = scmp.ne.s32.totalorder %s1813_s23, %s1809_s22  ;;  %s2421_s9 = smov (%p32_p0, %s31_s9), 0 }
   0xc   : > { %2401 = sst [smem:[#allocation11_spill]] %s2421_s9  ;;  %s2423_s10 = smov (!%p32_p0, %s34_s10), %s1833_s28 }
   0xd   : > { %p198_p2 = scmp.eq.s32.totalorder %s1433_s7, 7  ;;  %p203_p3 = scmp.ne.s32.totalorder %s1809_s22, %s1805_s21 }
   0xe   : > { %p36_p4 = scmp.ge.s32.totalorder %s2423_s10, 2  ;;  %p204_p5 = scmp.eq.s32.totalorder %s1434_s8, 7 }
   0xf   : > { %p1954_p6 = por %p198_p2, %p197_p1  ;;  %p1437_p8 = scmp.ge.s32.totalorder %s1841_s30, 1 }
  0x10   : > { %s2425_s10 = smov (%p36_p4, %s2423_s10), 0  ;;  %s2427_s11 = smov (!%p36_p4, %s38_s11), %s1837_s29 }
  0x11   : > { %2403 = sst [smem:[#allocation12_spill]] %s2425_s10  ;;  %p1961_p7 = por %p204_p5, %p203_p3 }
  0x12   : > { %p40_p9 = scmp.ge.s32.totalorder %s2427_s11, 2  ;;  %p260_p10 = scmp.lt.s32.totalorder %s1841_s30, 9 }
  0x13   : > { %s2404_s13 = scalar_select %p1961_p7, 1, 0 }
  0x14   : > { %s183_s14 = ssub.s32 %s1833_s28, %s2425_s10  ;;  %s2429_s11 = smov (%p40_p9, %s2427_s11), 0 }
  0x15   : > { %2405 = sst [smem:[#allocation13_spill]] %s2404_s13  ;;  %p261_p11 = pnand %p1437_p8, %p260_p10 }
  0x16   : > { %2406 = sst [smem:[#allocation14_spill]] %s2429_s11  ;;  %s182_s15 = ssub.s32 %s1837_s29, %s2429_s11 }
  0x17   : > { %s184_s16 = sor.u32 %s183_s14, %s182_s15  ;;  %s187_s17 = sadd.s32 1, %s1813_s23 }
  0x18   : > { %p185_p12 = scmp.eq.s32.totalorder %s184_s16, 0  ;;  %264 = sbr.rel (%p261_p11) target bundleno = 2777 (0xad9), region = 44 }
  0x19   : > { %s2394_s19 = sand.u32 (!%p261_p11), 1, %s1809_s22   ;;  %s1979_s20 = sshll.u32 (!%p261_p11), %s1821_s25, 1 }
  0x1a   : > { %s1975_s18 = scalar_select %p185_p12, %s1813_s23, %s187_s17  }
  0x1b   : > { %s1438_s7 = sshll.u32 (!%p261_p11), %s2394_s19, 4  ;;  %p304_p13 = scmp.lt.s32.totalorder (!%p261_p11), %s1825_s26, 1 }
  0x1c   : > { %2407 = sst [smem:[#allocation15_spill]] %s1975_s18  ;;  %p306_p0 = scmp.lt.s32.totalorder (!%p261_p11), %s1979_s20, 3 }
  0x1d   : > { %s305_s8 = scalar_select %p304_p13, %s1825_s26, 1 }
  0x1e   : > { %s307_s14 = scalar_select %p306_p0, %s1979_s20, 3 }
  0x1f   : > { %s1440_s15 = sshll.u32 %s305_s8, 2  ;;  %s1442_s16 = sshll.u32 %s1817_s24, 2 }
  0x20   : > { %s309_s17 = sadd.s32 %s1440_s15, %s307_s14  ;;  %p316_p1 = scmp.lt.s32.totalorder %s1442_s16, 7 }
  0x21   : > { %s1441_s11 = sshll.u32 %s309_s17, 2  ;;  %s1443_s25 = sshll.u32 %s305_s8, 3 }
  0x22   : > { %s1991_s29 = scalar_lea.vmem %s2382_s0, %s1441_s11  ;;  %s2431_s16 = smov (!%p316_p1, %s1442_s16), 7 }
  0x23   : > { %s319_s28 = sadd.s32 %s1443_s25, %s2431_s16  ;;  %s1998_s13 = scalar_lea.vmem [#allocation4], %s1438_s7 }
  0x24   : > { %s1444_s27 = sshll.u32 %s319_s28, 2  ;;  %p1445_p2 = scmp.ne.s32.totalorder %s1817_s24, 0 }
  0x25   : > { %s1996_s23 = scalar_lea.vmem %s2383_s1, %s1444_s27 }
  0x26   : > { %328 = sbr.rel (%p1445_p2) target bundleno = 53 (0x35), region = 48 }
  0x2b   : > { %vm329_vm0 = vcmask 7168   ;;  %vm347_vm1 = vcmask 261120   ;;  %v1843_v0 = vmov -1e+09   ;;  %v1844_v1 = vmov 0.0  }
  0x2c   : > { %330 = vst.msk [vmem:[#allocation2] sm:$0xff] %vm329_vm0, %v1843_v0  ;;  %331 = vst.msk [vmem:[#allocation2 + $0x8] sm:$0xff] %vm329_vm0, %v1843_v0 }
  0x2d   : > { %332 = vst.msk [vmem:[#allocation2 + $0x10] sm:$0xff] %vm329_vm0, %v1843_v0  ;;  %333 = vst.msk [vmem:[#allocation2 + $0x18] sm:$0xff] %vm329_vm0, %v1843_v0 }
  0x2e   : > { %334 = vst.msk [vmem:[#allocation2 + $0x20] sm:$0xff] %vm329_vm0, %v1843_v0  ;;  %335 = vst.msk [vmem:[#allocation2 + $0x28] sm:$0xff] %vm329_vm0, %v1843_v0 }
  0x2f   : > { %336 = vst.msk [vmem:[#allocation2 + $0x30] sm:$0xff] %vm329_vm0, %v1843_v0  ;;  %337 = vst.msk [vmem:[#allocation2 + $0x38] sm:$0xff] %vm329_vm0, %v1843_v0 }
  0x30   : > { %339 = vst.msk [vmem:[#allocation2 + $0x40] sm:$0xff] %vm329_vm0, %v1844_v1  ;;  %340 = vst.msk [vmem:[#allocation2 + $0x48] sm:$0xff] %vm329_vm0, %v1844_v1 }
  0x31   : > { %341 = vst.msk [vmem:[#allocation2 + $0x50] sm:$0xff] %vm329_vm0, %v1844_v1  ;;  %342 = vst.msk [vmem:[#allocation2 + $0x58] sm:$0xff] %vm329_vm0, %v1844_v1 }
  0x32   : > { %343 = vst.msk [vmem:[#allocation2 + $0x60] sm:$0xff] %vm329_vm0, %v1844_v1  ;;  %344 = vst.msk [vmem:[#allocation2 + $0x68] sm:$0xff] %vm329_vm0, %v1844_v1 }
  0x33   : > { %345 = vst.msk [vmem:[#allocation2 + $0x70] sm:$0xff] %vm329_vm0, %v1844_v1  ;;  %346 = vst.msk [vmem:[#allocation2 + $0x78] sm:$0xff] %vm329_vm0, %v1844_v1 }
  0x34   : > { %348 = vst.msk [vmem:[#allocation3] sm:$0xff] %vm347_vm1, %v1844_v1  ;;  %349 = vst.msk [vmem:[#allocation3 + $0x8] sm:$0xff] %vm347_vm1, %v1844_v1 }
  0x35 PF: > { %v354_v2 = vld [vmem:[%s2384_s2] sm:$0xf]  ;;  %vm379_vm2 = vcmask 1043456   ;;  %vm372_vm3 = vcmask 64512   ;;  %v1681_v5 = vld [vmem:[%s1996_s23 + $0x8] sm:$0xff]   ;;  %v1845_v6 = vmov 0.0  }
  0x36   : > { %v1680_v3 = vld [vmem:[%s1996_s23] sm:$0xff]   ;;  %1576 = vmatprep.subr.msk.bf16.mxu0 %vm379_vm2, %v354_v2  ;;  %v381_v4 = vsel %vm379_vm2, %v354_v2, 0  ;;  %vm1846_vm4 = vmmov 0   ;;  %vm558_vm5 = vcmask 261120   ;;  %v1847_v29 = vmov 0   ;;  %v2073_v37 = vld [vmem:[#allocation2 + $0x8] sm:$0xff] }
  0x37   : > { %1501 = vmatpush3.bf16.msra.mxu0 %v381_v4  ;;  %1502 = vmatprep.mubr.msk.bf16.mxu0 %vm372_vm3, %v1680_v3  ;;  %v1446_v8 = vld [vmem:[%s2385_s3] ss:$0 sm:$0xff]  ;;  %vm599_vm6 = vcmask 7168   ;;  %s1849_s7 = smov 112   ;;  %s1850_s8 = smov 104   ;;  %vm850_vm7 = vcmask 130112  }
  0x38   : > { %1508 = vmatprep.mubr.msk.bf16.mxu1 %vm372_vm3, %v1680_v3  ;;  %1512 = vmatprep.subr.bf16.mxu0 %v1845_v6  ;;  %v2046_v20 = vld [vmem:[%s1991_s29] sm:$0xff]   ;;  %s1848_s29 = smov 120   ;;  %s1851_s14 = smov 8   ;;  %vm1034_vm8 = vcmask 195712   ;;  %vm1218_vm9 = vcmask 261312  }
  0x39   : > { %v434_v21 = vld [vmem:[%s2386_s4] sm:$0xf]  ;;  %1678 = vset.pattern.permute.xlu1 %v1847_v29  ;;  %1679 = vset.pattern.permute.xlu0 %v1847_v29  ;;  %s1852_s15 = smov 16   ;;  %s1853_s16 = smov 24  }
  0x3a   : > { %1503 = vmatmul.mubr.msk.bf16.vlgmr.msra.gmra.mxu0 %vm372_vm3, %v1681_v5  ;;  %1577 = vmatprep.subr.msk.bf16.mxu1 %vm379_vm2, %v434_v21  ;;  %v443_v22 = vsel %vm379_vm2, %v434_v21, 0  ;;  %v2065_v31 = vld [vmem:[#allocation2] sm:$0xff]  ;;  %p1463_p3 = scmp.ne.s32.totalorder %s1817_s24, 1 }
  0x3b   : > { %1516 = vmatprep.mubr.msk.bf16.mxu0 %vm1846_vm4, %v1845_v6  ;;  %1507 = vmatpush3.bf16.msra.mxu1 %v443_v22  ;;  %v1451_v32 = vld [vmem:[%s2387_s5] ss:$0 sm:$0xff] }
  0x3c   : > { %1520 = vmatprep.subr.bf16.mxu1 %v1845_v6 }
  0x3e   : > { %1509 = vmatmul.mubr.msk.bf16.vlgmr.msra.gmra.mxu1 %vm372_vm3, %v1681_v5 }
  0x3f   : > { %1524 = vmatprep.mubr.msk.bf16.mxu1 %vm1846_vm4, %v1845_v6 }
  0xfa   : > { %v1504_v7 = vpop.f32.mrf.mxu0 }
  0xfb   : > { %v426_v11 = vadd.f32 %v1504_v7, %v1446_v8 }
  0xfc   : > { %v417_v9 = vpop.f32.mrf.mxu0 }
  0xfd   : > { %v418_v17 = vadd.f32 %v1446_v8, %v417_v9 }
  0xfe   : > { %v1505_v10 = vpop.f32.mrf.mxu0  ;;  %v1510_v30 = vpop.f32.mrf.mxu1 }
  0xff   : > { %v429_v12 = vadd.f32 %v1505_v10, %v1446_v8  ;;  %v488_v36 = vadd.f32 %v1510_v30, %v1451_v32  ;;  %v2122_v10 = vld [vmem:[#allocation2 + $0x10] sm:$0xff] }
 0x100   : > { %v420_v13 = vpop.f32.mrf.mxu0  ;;  %v479_v34 = vpop.f32.mrf.mxu1 }
 0x101   : > { %v2035_v14 = vpack.c.bf16 %v429_v12, %v426_v11  ;;  %v421_v15 = vadd.f32 %v1446_v8, %v420_v13  ;;  %v480_v43 = vadd.f32 %v1451_v32, %v479_v34  ;;  %v2127_v13 = vld [vmem:[#allocation2 + $0x18] sm:$0xff] }
 0x102   : > { %v1511_v38 = vpop.f32.mrf.mxu1 }
 0x103   : > { %v510_v16 = vsel %vm372_vm3, %v2035_v14, 0  ;;  %v2040_v18 = vpack.c.bf16 %v421_v15, %v418_v17  ;;  %v491_v40 = vadd.f32 %v1511_v38, %v1451_v32 }
 0x104   : > { %1513 = vmatpush3.bf16.xpose.msra.mxu0 %v510_v16  ;;  %v482_v45 = vpop.f32.mrf.mxu1 }
 0x105   : > { %1514 = vmatprep.subr.bf16.mxu0 %v1845_v6  ;;  %v507_v19 = vsel %vm372_vm3, %v2040_v18, 0  ;;  %v2083_v44 = vpack.c.bf16 %v491_v40, %v488_v36  ;;  %v483_v47 = vadd.f32 %v1451_v32, %v482_v45 }
 0x107   : > { %1521 = vmatpush3.bf16.msra.mxu1 %v2083_v44  ;;  %v2092_v48 = vpack.c.bf16 %v483_v47, %v480_v43 }
 0x108   : > { %1522 = vmatprep.subr.bf16.mxu1 %v1845_v6 }
 0x10b   : > { %1523 = vmatpush3.bf16.msra.mxu1 %v2092_v48 }
 0x10c   : > { %1515 = vmatpush3.bf16.xpose.msra.mxu0 %v507_v19  ;;  %1528 = vmatprep.subr.bf16.mxu1 %v1845_v6 }
 0x10d   : > { %1536 = vmatprep.subr.bf16.mxu0 %v1845_v6 }
 0x113   : > { %1517 = vmatmul.mubr.msk.bf16.vlgmr.msra.gmra.mxu0 %vm372_vm3, %v2046_v20 }
 0x114   : > { %1540 = vmatprep.mubr.msk.bf16.mxu0 %vm1846_vm4, %v1845_v6 }
 0x1d3   : > { %v546_v23 = vpop.f32.mrf.mxu0 }
 0x1d4   : > { %v559_v24 = vsel %vm558_vm5, %v546_v23, -inf }
 0x1d5   : > { %560 = vmax.xlane.f32.xlu0 %v559_v24  ;;  %v1518_v25 = vpop.f32.mrf.mxu0 }
 0x1d7   : > { %v549_v26 = vpop.f32.mrf.mxu0 }
 0x1d8   : > { %v562_v27 = vsel %vm558_vm5, %v549_v26, -inf }
 0x1d9   : > { %563 = vmax.xlane.f32.xlu0 %v562_v27  ;;  %v1519_v28 = vpop.f32.mrf.mxu0 }
 0x1ef   : > { %673 = vrot.lane.b32.xlu0 %v2035_v14, %s1848_s29 }
 0x25e   : > { %v561_v33 = vpop.xlane.xlu0 %560 }
 0x25f   : > { %v2071_v35 = vmax.f32 %v2065_v31, %v561_v33 }
 0x261   : > { %v567_v39 = vsub.f32 %v2065_v31, %v2071_v35  ;;  %665 = vst.msk [vmem:[#allocation2] sm:$0xff] %vm599_vm6, %v2071_v35  ;;  %575 = vperm.xlu1 %1678, %v2071_v35  }
 0x262   : > { %v564_v41 = vpop.xlane.xlu0 %563 }
 0x263   : > { %v2081_v42 = vmax.f32 %v2073_v37, %v564_v41 }
 0x265   : > { %v568_v46 = vsub.f32 %v2073_v37, %v2081_v42  ;;  %666 = vst.msk [vmem:[#allocation2 + $0x8] sm:$0xff] %vm599_vm6, %v2081_v42  ;;  %580 = vperm.xlu1 %1678, %v2081_v42  }
 0x266   : > { %v674_v57 = vpop.permute.xlu0 %673 }
 0x267   : > { %v682_v59 = vsel %vm372_vm3, %v674_v57, 0  ;;  %v2176_v57 = vld [vmem:[#allocation2 + $0x20] sm:$0xff] }
 0x269   : > { %671 = vrot.lane.b32.xlu1 %v2040_v18, %s1848_s29 }
 0x26d   : > { %667 = vrot.lane.b32.xlu1 %v2046_v20, %s1848_s29 }
 0x2dc   : > { %v576_v49 = vpop.permute.xlu1 %575 }
 0x2dd   : > { %v583_v50 = vsub.f32 %v546_v23, %v576_v49 }
 0x2df   : > { %v585_v51 = vmul.f32 1.442695, %v583_v50 }
 0x2e0   : > { %v581_v52 = vpop.permute.xlu1 %580 }
 0x2e1   : > { %v584_v53 = vsub.f32 %v549_v26, %v581_v52  ;;  %1683 = vpow2.f32 %v585_v51 }
 0x2e3   : > { %v587_v54 = vmul.f32 1.442695, %v584_v53 }
 0x2e4   : > { %v672_v60 = vpop.permute.xlu1 %671 }
 0x2e5   : > { %1685 = vpow2.f32 %v587_v54  ;;  %v679_v61 = vsel %vm372_vm3, %v672_v60, 0  ;;  %v2181_v60 = vld [vmem:[#allocation2 + $0x28] sm:$0xff] }
 0x2e8   : > { %v668_v62 = vpop.permute.xlu1 %667 }
 0x2ee   : > { %v2100_v55 = vpop.eup %1683 }
 0x2f2   : > { %v2102_v56 = vpop.eup %1685 }
 0x2f3   : > { %v602_v58 = vpack.c.bf16 %v2102_v56, %v2100_v55 }
 0x2f5   : > { %1525 = vmatmul.mubr.msk.bf16.vlgmr.msra.gmra.mxu1 %vm558_vm5, %v602_v58 }
 0x2f6   : > { %1529 = vmatpush3.bf16.xpose.msra.mxu1 %v682_v59  ;;  %1532 = vmatprep.mubr.msk.bf16.mxu1 %vm1846_vm4, %v1845_v6 }
 0x2f7   : > { %1530 = vmatprep.subr.bf16.mxu1 %v1845_v6 }
 0x2fe   : > { %1531 = vmatpush3.bf16.xpose.msra.mxu1 %v679_v61 }
 0x2ff   : > { %1552 = vmatprep.subr.bf16.mxu1 %v1845_v6 }
 0x305   : > { %1533 = vmatmul.mubr.msk.bf16.vlgmr.msra.gmra.mxu1 %vm372_vm3, %v668_v62 }
 0x306   : > { %1556 = vmatprep.mubr.msk.bf16.mxu1 %vm1846_vm4, %v1845_v6 }
 0x3b5   : > { %v2116_v63 = vpop.f32.mrf.mxu1 }
 0x3b7   : > { %v1526_v0 = vpop.f32.mrf.mxu1 }
 0x3b9   : > { %v2118_v1 = vpop.f32.mrf.mxu1 }
 0x3bb   : > { %v1527_v2 = vpop.f32.mrf.mxu1 }
 0x3c5   : > { %v718_v3 = vpop.f32.mrf.mxu1 }
 0x3c6   : > { %v731_v4 = vsel %vm558_vm5, %v718_v3, -inf }
 0x3c7   : > { %732 = vmax.xlane.f32.xlu1 %v731_v4  ;;  %v1534_v5 = vpop.f32.mrf.mxu1 }
 0x3c9   : > { %v721_v7 = vpop.f32.mrf.mxu1 }
 0x3ca   : > { %v734_v8 = vsel %vm558_vm5, %v721_v7, -inf }
 0x3cb   : > { %735 = vmax.xlane.f32.xlu0 %v734_v8  ;;  %v1535_v9 = vpop.f32.mrf.mxu1 }
 0x450   : > { %v733_v11 = vpop.xlane.xlu1 %732 }
 0x451   : > { %v2125_v12 = vmax.f32 %v2122_v10, %v733_v11 }
 0x453   : > { %v739_v15 = vsub.f32 %v2122_v10, %v2125_v12  ;;  %853 = vst.msk [vmem:[#allocation2 + $0x10] sm:$0xff] %vm599_vm6, %v2125_v12  ;;  %747 = vperm.xlu1 %1678, %v2125_v12  }
 0x454   : > { %v736_v16 = vpop.xlane.xlu0 %735 }
 0x455   : > { %v2135_v17 = vmax.f32 %v2127_v13, %v736_v16 }
 0x457   : > { %v740_v19 = vsub.f32 %v2127_v13, %v2135_v17  ;;  %854 = vst.msk [vmem:[#allocation2 + $0x18] sm:$0xff] %vm599_vm6, %v2135_v17  ;;  %778 = vrot.lane.b32.xlu1 %v2083_v44, %s1848_s29  ;;  %752 = vperm.xlu0 %1679, %v2135_v17  }
 0x45b   : > { %776 = vrot.lane.b32.xlu1 %v2092_v48, %s1848_s29 }
 0x45f   : > { %859 = vrot.lane.b32.xlu1 %v2035_v14, %s1849_s7 }
 0x463   : > { %857 = vrot.lane.b32.xlu1 %v2040_v18, %s1849_s7 }
 0x467   : > { %855 = vrot.lane.b32.xlu1 %v2046_v20, %s1849_s7 }
 0x4ce   : > { %v748_v21 = vpop.permute.xlu1 %747 }
 0x4cf   : > { %v755_v22 = vsub.f32 %v718_v3, %v748_v21 }
 0x4d1   : > { %v757_v23 = vmul.f32 1.442695, %v755_v22 }
 0x4d2   : > { %v779_v24 = vpop.permute.xlu1 %778  ;;  %v753_v25 = vpop.permute.xlu0 %752 }
 0x4d3   : > { %v756_v26 = vsub.f32 %v721_v7, %v753_v25  ;;  %1537 = vmatpush3.bf16.msra.mxu0 %v779_v24  ;;  %1687 = vpow2.f32 %v757_v23 }
 0x4d4   : > { %1538 = vmatprep.subr.bf16.mxu0 %v1845_v6 }
 0x4d5   : > { %v759_v27 = vmul.f32 1.442695, %v756_v26 }
 0x4d6   : > { %v777_v28 = vpop.permute.xlu1 %776 }
 0x4d7   : > { %1689 = vpow2.f32 %v759_v27  ;;  %1539 = vmatpush3.bf16.msra.mxu0 %v777_v28 }
 0x4d8   : > { %1544 = vmatprep.subr.bf16.mxu0 %v1845_v6 }
 0x4da   : > { %v860_v32 = vpop.permute.xlu1 %859 }
 0x4db   : > { %v868_v34 = vsel %vm372_vm3, %v860_v32, 0 }
 0x4de   : > { %v858_v36 = vpop.permute.xlu1 %857 }
 0x4df   : > { %v865_v38 = vsel %vm372_vm3, %v858_v36, 0 }
 0x4e0   : > { %v2154_v29 = vpop.eup %1687 }
 0x4e2   : > { %v856_v40 = vpop.permute.xlu1 %855 }
 0x4e4   : > { %v2156_v30 = vpop.eup %1689 }
 0x4e5   : > { %v773_v33 = vpack.c.bf16 %v2156_v30, %v2154_v29 }
 0x4e7   : > { %1541 = vmatmul.mubr.msk.bf16.vlgmr.msra.gmra.mxu0 %vm558_vm5, %v773_v33 }
 0x4e8   : > { %1545 = vmatpush3.bf16.xpose.msra.mxu0 %v868_v34  ;;  %1548 = vmatprep.mubr.msk.bf16.mxu0 %vm1846_vm4, %v1845_v6 }
 0x4e9   : > { %1546 = vmatprep.subr.bf16.mxu0 %v1845_v6 }
 0x4f0   : > { %1547 = vmatpush3.bf16.xpose.msra.mxu0 %v865_v38 }
 0x4f1   : > { %1568 = vmatprep.subr.bf16.mxu0 %v1845_v6 }
 0x4f7   : > { %1549 = vmatmul.mubr.msk.bf16.vlgmr.msra.gmra.mxu0 %vm372_vm3, %v856_v40 }
 0x4f8   : > { %1572 = vmatprep.mubr.msk.bf16.mxu0 %vm1846_vm4, %v1845_v6 }
 0x5a7   : > { %v2170_v41 = vpop.f32.mrf.mxu0 }
 0x5a9   : > { %v1542_v43 = vpop.f32.mrf.mxu0 }
 0x5ab   : > { %v2172_v45 = vpop.f32.mrf.mxu0 }
 0x5ad   : > { %v1543_v47 = vpop.f32.mrf.mxu0 }
 0x5ae   : > { %v1096_v47 = vld [vmem:[#allocation2 + $0x30] sm:$0xff] }
 0x5b7   : > { %v904_v49 = vpop.f32.mrf.mxu0 }
 0x5b8   : > { %v917_v50 = vsel %vm558_vm5, %v904_v49, -inf }
 0x5b9   : > { %918 = vmax.xlane.f32.xlu1 %v917_v50  ;;  %v1550_v51 = vpop.f32.mrf.mxu0 }
 0x5ba   : > { %v1097_v51 = vld [vmem:[#allocation2 + $0x38] sm:$0xff] }
 0x5bb   : > { %v907_v52 = vpop.f32.mrf.mxu0 }
 0x5bc   : > { %v920_v53 = vsel %vm558_vm5, %v907_v52, -inf }
 0x5bd   : > { %921 = vmax.xlane.f32.xlu0 %v920_v53  ;;  %v1551_v54 = vpop.f32.mrf.mxu0 }
 0x642   : > { %v919_v58 = vpop.xlane.xlu1 %918 }
 0x643   : > { %v2179_v59 = vmax.f32 %v2176_v57, %v919_v58 }
 0x645   : > { %v925_v61 = vsub.f32 %v2176_v57, %v2179_v59  ;;  %1037 = vst.msk [vmem:[#allocation2 + $0x20] sm:$0xff] %vm599_vm6, %v2179_v59  ;;  %933 = vperm.xlu1 %1678, %v2179_v59  }
 0x646   : > { %v922_v62 = vpop.xlane.xlu0 %921 }
 0x647   : > { %v2189_v0 = vmax.f32 %v2181_v60, %v922_v62  ;;  %v594_v62 = vsel %vm558_vm5, %v2102_v56, 0.0  ;;  %v741_v56 = vmul.f32 1.442695, %v739_v15  ;;  %v927_v35 = vmul.f32 1.442695, %v925_v61 }
 0x649   : > { %v926_v2 = vsub.f32 %v2181_v60, %v2189_v0  ;;  %1038 = vst.msk [vmem:[#allocation2 + $0x28] sm:$0xff] %vm599_vm6, %v2189_v0  ;;  %962 = vrot.lane.b32.xlu1 %v2083_v44, %s1849_s7  ;;  %938 = vperm.xlu0 %1679, %v2189_v0  }
 0x64b   : > { %v929_v31 = vmul.f32 1.442695, %v926_v2 }
 0x64d   : > { %960 = vrot.lane.b32.xlu1 %v2092_v48, %s1849_s7  ;;  %1039 = vrot.lane.b32.xlu0 %v2046_v20, %s1850_s8 }
 0x651   : > { %1043 = vrot.lane.b32.xlu1 %v2035_v14, %s1850_s8 }
 0x655   : > { %1041 = vrot.lane.b32.xlu1 %v2040_v18, %s1850_s8 }
 0x6c0   : > { %v934_v3 = vpop.permute.xlu1 %933 }
 0x6c1   : > { %v941_v4 = vsub.f32 %v904_v49, %v934_v3  ;;  %v766_v3 = vsel %vm558_vm5, %v2156_v30, 0.0  ;;  %v743_v30 = vmul.f32 1.442695, %v740_v19 }
 0x6c3   : > { %v943_v5 = vmul.f32 1.442695, %v941_v4  ;;  %v591_v4 = vsel %vm558_vm5, %v2100_v55, 0.0  ;;  %v571_v55 = vmul.f32 1.442695, %v568_v46 }
 0x6c4   : > { %v963_v7 = vpop.permute.xlu1 %962  ;;  %v939_v8 = vpop.permute.xlu0 %938 }
 0x6c5   : > { %v942_v9 = vsub.f32 %v907_v52, %v939_v8  ;;  %1553 = vmatpush3.bf16.msra.mxu1 %v963_v7  ;;  %1691 = vpow2.f32 %v943_v5  ;;  %v763_v5 = vsel %vm558_vm5, %v2154_v29, 0.0 }
 0x6c6   : > { %1554 = vmatprep.subr.bf16.mxu1 %v1845_v6 }
 0x6c7   : > { %v945_v11 = vmul.f32 1.442695, %v942_v9 }
 0x6c8   : > { %v961_v16 = vpop.permute.xlu1 %960  ;;  %v1040_v25 = vpop.permute.xlu0 %1039 }
 0x6c9   : > { %1693 = vpow2.f32 %v945_v11  ;;  %1555 = vmatpush3.bf16.msra.mxu1 %v961_v16  ;;  %v557_v16 = vld [vmem:[#allocation2 + $0x48] sm:$0xff] }
 0x6ca   : > { %1560 = vmatprep.subr.bf16.mxu1 %v1845_v6 }
 0x6cc   : > { %v1044_v21 = vpop.permute.xlu1 %1043 }
 0x6cd   : > { %v1052_v22 = vsel %vm372_vm3, %v1044_v21, 0 }
 0x6d0   : > { %v1042_v23 = vpop.permute.xlu1 %1041 }
 0x6d1   : > { %v1049_v24 = vsel %vm372_vm3, %v1042_v23, 0 }
 0x6d2   : > { %v1692_v14 = vpop.eup %1691 }
 0x6d3   : > { %v949_v29 = vsel %vm558_vm5, %v1692_v14, 0.0 }
 0x6d6   : > { %v1694_v20 = vpop.eup %1693 }
 0x6d7   : > { %v959_v18 = vpack.c.bf16 %v1694_v20, %v1692_v14 }
 0x6d9   : > { %1557 = vmatmul.mubr.msk.bf16.vlgmr.msra.gmra.mxu1 %vm558_vm5, %v959_v18  ;;  %v730_v18 = vld [vmem:[#allocation2 + $0x58] sm:$0xff] }
 0x6da   : > { %1561 = vmatpush3.bf16.xpose.msra.mxu1 %v1052_v22  ;;  %1564 = vmatprep.mubr.msk.bf16.mxu1 %vm1846_vm4, %v1845_v6 }
 0x6db   : > { %1562 = vmatprep.subr.bf16.mxu1 %v1845_v6 }
 0x6e2   : > { %1563 = vmatpush3.bf16.xpose.msra.mxu1 %v1049_v24 }
 0x6e9   : > { %1565 = vmatmul.mubr.msk.bf16.vlgmr.msra.gmra.mxu1 %vm372_vm3, %v1040_v25  ;;  %v556_v25 = vld [vmem:[#allocation2 + $0x40] sm:$0xff] }
 0x799   : > { %v2215_v26 = vpop.f32.mrf.mxu1 }
 0x79b   : > { %v1558_v27 = vpop.f32.mrf.mxu1 }
 0x79d   : > { %v2217_v28 = vpop.f32.mrf.mxu1 }
 0x79f   : > { %v1559_v32 = vpop.f32.mrf.mxu1 }
 0x7a9   : > { %v2219_v33 = vpop.f32.mrf.mxu1 }
 0x7aa   : > { %v1101_v34 = vsel %vm558_vm5, %v2219_v33, -inf }
 0x7ab   : > { %1102 = vmax.xlane.f32.xlu1 %v1101_v34  ;;  %v1566_v36 = vpop.f32.mrf.mxu1 }
 0x7ad   : > { %v2223_v38 = vpop.f32.mrf.mxu1 }
 0x7ae   : > { %v1104_v40 = vsel %vm558_vm5, %v2223_v38, -inf }
 0x7af   : > { %1105 = vmax.xlane.f32.xlu0 %v1104_v40  ;;  %v1567_v43 = vpop.f32.mrf.mxu1  ;;  %v916_v40 = vld [vmem:[#allocation2 + $0x68] sm:$0xff] }
 0x834   : > { %v1103_v49 = vpop.xlane.xlu1 %1102 }
 0x835   : > { %v1107_v50 = vmax.f32 %v1096_v47, %v1103_v49 }
 0x837   : > { %v1109_v52 = vsub.f32 %v1096_v47, %v1107_v50  ;;  %1221 = vst.msk [vmem:[#allocation2 + $0x30] sm:$0xff] %vm599_vm6, %v1107_v50  ;;  %1117 = vperm.xlu0 %1679, %v1107_v50  }
 0x838   : > { %v1106_v53 = vpop.xlane.xlu0 %1105 }
 0x839   : > { %v1108_v54 = vmax.f32 %v1097_v51, %v1106_v53  ;;  %v1111_v37 = vmul.f32 1.442695, %v1109_v52  ;;  %v647_v52 = vld [vmem:[#allocation3] sm:$0xff] }
 0x83b   : > { %v1110_v58 = vsub.f32 %v1097_v51, %v1108_v54  ;;  %1222 = vst.msk [vmem:[#allocation2 + $0x38] sm:$0xff] %vm599_vm6, %v1108_v54  ;;  %1144 = vrot.lane.b32.xlu0 %v2092_v48, %s1850_s8  ;;  %1122 = vperm.xlu1 %1678, %v1108_v54   ;;  %v569_v48 = vmul.f32 1.442695, %v567_v39  ;;  %v915_v51 = vld [vmem:[#allocation2 + $0x60] sm:$0xff] }
 0x83d   : > { %1695 = vpow2.f32 %v569_v48  ;;  %v1113_v46 = vmul.f32 1.442695, %v1110_v58 }
 0x83e   : > { %1697 = vpow2.f32 %v571_v55 }
 0x83f   : > { %1146 = vrot.lane.b32.xlu1 %v2083_v44, %s1850_s8  ;;  %v952_v44 = vsel %vm558_vm5, %v1694_v20, 0.0  ;;  %1699 = vpow2.f32 %v741_v56 }
 0x840   : > { %1701 = vpow2.f32 %v743_v30 }
 0x841   : > { %1703 = vpow2.f32 %v929_v31 }
 0x842   : > { %1705 = vpow2.f32 %v927_v35 }
 0x843   : > { %1707 = vpow2.f32 %v1111_v37 }
 0x844   : > { %1709 = vpow2.f32 %v1113_v46 }
 0x84a   : > { %v1696_v39 = vpop.eup %1695 }
 0x84b   : > { %v1698_v42 = vpop.eup %1697 }
 0x84c   : > { %v1700_v10 = vpop.eup %1699  ;;  %v590_v20 = vmul.f32 %v1698_v42, %v557_v16 }
 0x84d   : > { %v1702_v12 = vpop.eup %1701 }
 0x84e   : > { %v1704_v13 = vpop.eup %1703  ;;  %v762_v22 = vmul.f32 %v1702_v12, %v730_v18 }
 0x84f   : > { %v1706_v19 = vpop.eup %1705  ;;  %v948_v43 = vmul.f32 %v1704_v13, %v916_v40 }
 0x850   : > { %v2268_v59 = vpop.eup %1707  ;;  %v947_v54 = vmul.f32 %v1706_v19, %v915_v51 }
 0x851   : > { %v2272_v0 = vpop.eup %1709 }
 0x85a   : > { %595 = vadd.xlane.f32.xlu0 %v594_v62 }
 0x85e   : > { %767 = vadd.xlane.f32.xlu0 %v766_v3 }
 0x863   : > { %592 = vadd.xlane.f32.xlu1 %v591_v4 }
 0x867   : > { %764 = vadd.xlane.f32.xlu1 %v763_v5  ;;  %v648_v5 = vld [vmem:[#allocation3 + $0x8] sm:$0xff] }
 0x874   : > { %844 = vrot.lane.b32.xlu0 %v2172_v45, %s1851_s14 }
 0x878   : > { %842 = vrot.lane.b32.xlu1 %v2170_v41, %s1851_s14 }
 0x893   : > { %953 = vadd.xlane.f32.xlu0 %v952_v44 }
 0x89c   : > { %950 = vadd.xlane.f32.xlu1 %v949_v29 }
 0x8a9   : > { %651 = vperm.xlu0 %1679, %v1696_v39  }
 0x8ad   : > { %830 = vperm.xlu0 %1679, %v1700_v10   ;;  %656 = vperm.xlu1 %1678, %v1698_v42  }
 0x8b1   : > { %835 = vperm.xlu1 %1678, %v1702_v12   ;;  %1019 = vperm.xlu0 %1679, %v1704_v13  }
 0x8b2   : > { %v1118_v15 = vpop.permute.xlu0 %1117 }
 0x8b3   : > { %v1125_v17 = vsub.f32 %v2219_v33, %v1118_v15 }
 0x8b5   : > { %1014 = vperm.xlu1 %1678, %v1706_v19   ;;  %1026 = vrot.lane.b32.xlu0 %v2215_v26, %s1852_s15  ;;  %v1127_v41 = vmul.f32 1.442695, %v1125_v17  ;;  %v589_v26 = vmul.f32 %v1696_v39, %v556_v25 }
 0x8b6   : > { %v1123_v45 = vpop.permute.xlu1 %1122  ;;  %v1145_v2 = vpop.permute.xlu0 %1144 }
 0x8b7   : > { %v1126_v57 = vsub.f32 %v2223_v38, %v1123_v45  ;;  %1711 = vpow2.f32 %v1127_v41 }
 0x8b9   : > { %v1129_v60 = vmul.f32 1.442695, %v1126_v57  ;;  %1028 = vrot.lane.b32.xlu1 %v2217_v28, %s1852_s15  ;;  %1198 = vperm.xlu0 %1679, %v2268_v59   ;;  %v729_v28 = vld [vmem:[#allocation2 + $0x50] sm:$0xff]  ;;  %v1100_v57 = vld [vmem:[#allocation2 + $0x78] sm:$0xff] }
 0x8ba   : > { %v1147_v61 = vpop.permute.xlu1 %1146  ;;  %v761_v33 = vmul.f32 %v1700_v10, %v729_v28 }
 0x8bb   : > { %1713 = vpow2.f32 %v1129_v60  ;;  %1569 = vmatpush3.bf16.msra.mxu0 %v1147_v61  ;;  %v1132_v60 = vmul.f32 %v2272_v0, %v1100_v57 }
 0x8bc   : > { %1570 = vmatprep.subr.bf16.mxu0 %v1845_v6 }
 0x8bd   : > { %1203 = vperm.xlu1 %1678, %v2272_v0  }
 0x8bf   : > { %1571 = vmatpush3.bf16.msra.mxu0 %v1145_v2 }
 0x8c4   : > { %v1712_v7 = vpop.eup %1711 }
 0x8c5   : > { %v1133_v14 = vsel %vm558_vm5, %v1712_v7, 0.0 }
 0x8c8   : > { %v1714_v8 = vpop.eup %1713 }
 0x8c9   : > { %v1143_v9 = vpack.c.bf16 %v1714_v8, %v1712_v7  ;;  %v1136_v11 = vsel %vm558_vm5, %v1714_v8, 0.0  ;;  %v1099_v8 = vld [vmem:[#allocation2 + $0x70] sm:$0xff] }
 0x8cb   : > { %1573 = vmatmul.mubr.msk.bf16.vlgmr.msra.gmra.mxu0 %vm558_vm5, %v1143_v9  ;;  %v1131_v9 = vmul.f32 %v2268_v59, %v1099_v8 }
 0x8d8   : > { %1137 = vadd.xlane.f32.xlu0 %v1136_v11 }
 0x8e1   : > { %1134 = vadd.xlane.f32.xlu1 %v1133_v14 }
 0x8e3   : > { %v596_v21 = vpop.xlane.xlu0 %595 }
 0x8e4   : > { %v598_v6 = vadd.f32 %v596_v21, %v590_v20 }
 0x8e6   : > { %601 = vst.msk [vmem:[#allocation2 + $0x48] sm:$0xff] %vm599_vm6, %v598_v6 }
 0x8e7   : > { %v768_v23 = vpop.xlane.xlu0 %767 }
 0x8e8   : > { %v770_v24 = vadd.f32 %v768_v23, %v762_v22 }
 0x8ea   : > { %772 = vst.msk [vmem:[#allocation2 + $0x58] sm:$0xff] %vm599_vm6, %v770_v24 }
 0x8eb   : > { %v845_v38 = vpop.permute.xlu0 %844 }
 0x8ec   : > { %v593_v27 = vpop.xlane.xlu1 %592 }
 0x8ed   : > { %v597_v32 = vadd.f32 %v593_v27, %v589_v26 }
 0x8ef   : > { %600 = vst.msk [vmem:[#allocation2 + $0x40] sm:$0xff] %vm599_vm6, %v597_v32 }
 0x8f0   : > { %v765_v34 = vpop.xlane.xlu1 %764 }
 0x8f1   : > { %v769_v36 = vadd.f32 %v765_v34, %v761_v33 }
 0x8f3   : > { %771 = vst.msk [vmem:[#allocation2 + $0x50] sm:$0xff] %vm599_vm6, %v769_v36 }
 0x8f4   : > { %v843_v50 = vpop.permute.xlu1 %842 }
 0x91c   : > { %v954_v47 = vpop.xlane.xlu0 %953 }
 0x91d   : > { %v956_v49 = vadd.f32 %v954_v47, %v948_v43 }
 0x91f   : > { %958 = vst.msk [vmem:[#allocation2 + $0x68] sm:$0xff] %vm599_vm6, %v956_v49 }
 0x924   : > { %v652_v53 = vpop.permute.xlu0 %651 }
 0x925   : > { %v659_v58 = vmul.f32 %v652_v53, %v647_v52  ;;  %v951_v62 = vpop.xlane.xlu1 %950 }
 0x926   : > { %v955_v3 = vadd.f32 %v951_v62, %v947_v54 }
 0x927   : > { %v661_v4 = vadd.f32 %v659_v58, %v2116_v63 }
 0x928   : > { %957 = vst.msk [vmem:[#allocation2 + $0x60] sm:$0xff] %vm599_vm6, %v955_v3  ;;  %v831_v29 = vpop.permute.xlu0 %830 }
 0x929   : > { %663 = vst.msk [vmem:[#allocation3] sm:$0xff] %vm372_vm3, %v661_v4  ;;  %v657_v44 = vpop.permute.xlu1 %656 }
 0x92a   : > { %v660_v48 = vmul.f32 %v657_v44, %v648_v5 }
 0x92c   : > { %v662_v55 = vadd.f32 %v660_v48, %v2118_v1  ;;  %v1020_v39 = vpop.permute.xlu0 %1019 }
 0x92d   : > { %v836_v63 = vpop.permute.xlu1 %835 }
 0x92e   : > { %664 = vst.msk [vmem:[#allocation3 + $0x8] sm:$0xff] %vm372_vm3, %v662_v55 }
 0x930   : > { %v826_v56 = vld [vmem:[#allocation3] sm:$0xff]  ;;  %v1027_v1 = vpop.permute.xlu0 %1026 }
 0x931   : > { %v838_v30 = vmul.f32 %v831_v29, %v826_v56  ;;  %v1015_v46 = vpop.permute.xlu1 %1014 }
 0x933   : > { %v848_v31 = vadd.f32 %v843_v50, %v838_v30 }
 0x934   : > { %v1199_v45 = vpop.permute.xlu0 %1198 }
 0x935   : > { %851 = vst.msk [vmem:[#allocation3] sm:$0xff] %vm850_vm7, %v848_v31  ;;  %v827_v35 = vld [vmem:[#allocation3 + $0x8] sm:$0xff]  ;;  %v1029_v19 = vpop.permute.xlu1 %1028 }
 0x936   : > { %v839_v37 = vmul.f32 %v836_v63, %v827_v35 }
 0x938   : > { %v849_v42 = vadd.f32 %v845_v38, %v839_v37 }
 0x939   : > { %v1204_v7 = vpop.permute.xlu1 %1203 }
 0x93a   : > { %852 = vst.msk [vmem:[#allocation3 + $0x8] sm:$0xff] %vm850_vm7, %v849_v42 }
 0x93c   : > { %v1010_v10 = vld [vmem:[#allocation3] sm:$0xff] }
 0x93d   : > { %v1022_v12 = vmul.f32 %v1015_v46, %v1010_v10 }
 0x93f   : > { %v1032_v13 = vadd.f32 %v1027_v1, %v1022_v12 }
 0x941   : > { %1035 = vst.msk [vmem:[#allocation3] sm:$0xff] %vm1034_vm8, %v1032_v13  ;;  %v1011_v15 = vld [vmem:[#allocation3 + $0x8] sm:$0xff] }
 0x942   : > { %v1023_v17 = vmul.f32 %v1020_v39, %v1011_v15 }
 0x944   : > { %v1033_v41 = vadd.f32 %v1029_v19, %v1023_v17 }
 0x946   : > { %1036 = vst.msk [vmem:[#allocation3 + $0x8] sm:$0xff] %vm1034_vm8, %v1033_v41 }
 0x948   : > { %v1194_v0 = vld [vmem:[#allocation3] sm:$0xff] }
 0x949   : > { %v1206_v6 = vmul.f32 %v1199_v45, %v1194_v0 }
 0x94d   : > { %v1195_v22 = vld [vmem:[#allocation3 + $0x8] sm:$0xff] }
 0x94e   : > { %v1207_v25 = vmul.f32 %v1204_v7, %v1195_v22 }
 0x961   : > { %v1138_v61 = vpop.xlane.xlu0 %1137 }
 0x962   : > { %v1140_v2 = vadd.f32 %v1138_v61, %v1132_v60 }
 0x964   : > { %1142 = vst.msk [vmem:[#allocation2 + $0x78] sm:$0xff] %vm599_vm6, %v1140_v2 }
 0x96a   : > { %v1135_v11 = vpop.xlane.xlu1 %1134 }
 0x96b   : > { %v1139_v16 = vadd.f32 %v1135_v11, %v1131_v9 }
 0x96d   : > { %1141 = vst.msk [vmem:[#allocation2 + $0x70] sm:$0xff] %vm599_vm6, %v1139_v16 }
 0x98b   : > { %v1187_v14 = vpop.f32.mrf.mxu0 }
 0x98c   : > { %1210 = vrot.lane.b32.xlu1 %v1187_v14, %s1853_s16 }
 0x98d   : > { %v1574_v20 = vpop.f32.mrf.mxu0 }
 0x98f   : > { %v1190_v21 = vpop.f32.mrf.mxu0 }
 0x990   : > { %1212 = vrot.lane.b32.xlu0 %v1190_v21, %s1853_s16 }
 0x991   : > { %v1575_v18 = vpop.f32.mrf.mxu0 }
 0x9fe   : > { %v1211_v23 = vpop.permute.xlu1 %1210 }
 0x9ff   : > { %v1216_v24 = vadd.f32 %v1211_v23, %v1206_v6 }
 0xa01   : > { %1219 = vst.msk [vmem:[#allocation3] sm:$0xff] %vm1218_vm9, %v1216_v24  ;;  %1226 = sbr.rel (%p1463_p3) target bundleno = 2751 (0xabf), region = 52 }
 0xa02   : > { %v1213_v59 = vpop.permute.xlu0 %1212 }
 0xa03   : > { %v1217_v26 = vadd.f32 %v1213_v59, %v1207_v25 }
 0xa05   : > { %1220 = vst.msk [vmem:[#allocation3 + $0x8] sm:$0xff] %vm1218_vm9, %v1217_v26 }
 0xa06   : > { %v1247_v27 = vld [vmem:[#allocation2 + $0x50] sm:$0xff]  ;;  %v1227_v28 = vld [vmem:[#allocation2 + $0x40] sm:$0xff]  ;;  %v1248_v32 = vld [vmem:[#allocation2 + $0x58] sm:$0xff]  ;;  %v1854_v33 = vmov 0  }
 0xa07   : > { %1716 = vset.pattern.permute.xlu1 %v1854_v33  ;;  %1715 = vset.pattern.permute.xlu0 %v1854_v33  ;;  %1717 = vrcp.f32 %v1247_v27  ;;  %v1228_v34 = vld [vmem:[#allocation2 + $0x48] sm:$0xff]  ;;  %v1267_v38 = vld [vmem:[#allocation2 + $0x60] sm:$0xff]  ;;  %v1288_v40 = vld [vmem:[#allocation2 + $0x78] sm:$0xff] }
 0xa08   : > { %1719 = vrcp.f32 %v1227_v28  ;;  %v1268_v36 = vld [vmem:[#allocation2 + $0x68] sm:$0xff]  ;;  %v1287_v43 = vld [vmem:[#allocation2 + $0x70] sm:$0xff]  ;;  %v1231_v62 = vld [vmem:[#allocation3] sm:$0xff] }
 0xa09   : > { %1721 = vrcp.f32 %v1248_v32 }
 0xa0a   : > { %1723 = vrcp.f32 %v1228_v34 }
 0xa0b   : > { %1725 = vrcp.f32 %v1268_v36 }
 0xa0c   : > { %1727 = vrcp.f32 %v1267_v38  ;;  %v1232_v5 = vld [vmem:[#allocation3 + $0x8] sm:$0xff] }
 0xa0d   : > { %1729 = vrcp.f32 %v1288_v40 }
 0xa0e   : > { %1731 = vrcp.f32 %v1287_v43 }
 0xa14   : > { %v1718_v47 = vpop.eup %1717 }
 0xa15   : > { %v1720_v49 = vpop.eup %1719  ;;  %1255 = vperm.xlu1 %1716, %v1718_v47  }
 0xa16   : > { %v1722_v50 = vpop.eup %1721  ;;  %1235 = vperm.xlu0 %1715, %v1720_v49  }
 0xa17   : > { %v1724_v51 = vpop.eup %1723 }
 0xa18   : > { %v1726_v52 = vpop.eup %1725 }
 0xa19   : > { %1260 = vperm.xlu1 %1716, %v1722_v50   ;;  %v1728_v53 = vpop.eup %1727 }
 0xa1a   : > { %1240 = vperm.xlu0 %1715, %v1724_v51   ;;  %v1730_v54 = vpop.eup %1729 }
 0xa1b   : > { %v1732_v58 = vpop.eup %1731 }
 0xa1d   : > { %1280 = vperm.xlu1 %1716, %v1726_v52  }
 0xa1e   : > { %1275 = vperm.xlu0 %1715, %v1728_v53  }
 0xa21   : > { %1300 = vperm.xlu1 %1716, %v1730_v54  }
 0xa22   : > { %1295 = vperm.xlu0 %1715, %v1732_v58  }
 0xa90   : > { %v1256_v55 = vpop.permute.xlu1 %1255 }
 0xa91   : > { %v1236_v3 = vpop.permute.xlu0 %1235 }
 0xa92   : > { %v1243_v4 = vmul.f32 %v1236_v3, %v1231_v62 }
 0xa94   : > { %1245 = vst.msk [vmem:[#allocation3] sm:$0xff] %vm372_vm3, %v1243_v4  ;;  %v1261_v30 = vpop.permute.xlu1 %1260 }
 0xa95   : > { %v1241_v44 = vpop.permute.xlu0 %1240 }
 0xa96   : > { %v1244_v48 = vmul.f32 %v1241_v44, %v1232_v5 }
 0xa98   : > { %1246 = vst.msk [vmem:[#allocation3 + $0x8] sm:$0xff] %vm372_vm3, %v1244_v48  ;;  %v1281_v42 = vpop.permute.xlu1 %1280 }
 0xa99   : > { %v1276_v37 = vpop.permute.xlu0 %1275 }
 0xa9b   : > { %v1251_v56 = vld [vmem:[#allocation3] sm:$0xff] }
 0xa9c   : > { %v1263_v29 = vmul.f32 %v1256_v55, %v1251_v56  ;;  %v1301_v15 = vpop.permute.xlu1 %1300 }
 0xa9d   : > { %v1296_v1 = vpop.permute.xlu0 %1295 }
 0xa9e   : > { %1265 = vst.msk [vmem:[#allocation3] sm:$0xff] %vm850_vm7, %v1263_v29 }
 0xa9f   : > { %v1252_v31 = vld [vmem:[#allocation3 + $0x8] sm:$0xff] }
 0xaa0   : > { %v1264_v35 = vmul.f32 %v1261_v30, %v1252_v31 }
 0xaa2   : > { %1266 = vst.msk [vmem:[#allocation3 + $0x8] sm:$0xff] %vm850_vm7, %v1264_v35 }
 0xaa5   : > { %v1271_v63 = vld [vmem:[#allocation3] sm:$0xff] }
 0xaa6   : > { %v1283_v39 = vmul.f32 %v1276_v37, %v1271_v63 }
 0xaa8   : > { %1285 = vst.msk [vmem:[#allocation3] sm:$0xff] %vm1034_vm8, %v1283_v39 }
 0xaa9   : > { %v1272_v46 = vld [vmem:[#allocation3 + $0x8] sm:$0xff] }
 0xaaa   : > { %v1284_v10 = vmul.f32 %v1281_v42, %v1272_v46 }
 0xaac   : > { %1286 = vst.msk [vmem:[#allocation3 + $0x8] sm:$0xff] %vm1034_vm8, %v1284_v10 }
 0xaaf   : > { %v1291_v12 = vld [vmem:[#allocation3] sm:$0xff] }
 0xab0   : > { %v1303_v13 = vmul.f32 %v1296_v1, %v1291_v12 }
 0xab2   : > { %1305 = vst.msk [vmem:[#allocation3] sm:$0xff] %vm1218_vm9, %v1303_v13 }
 0xab3   : > { %v1292_v17 = vld [vmem:[#allocation3 + $0x8] sm:$0xff] }
 0xab4   : > { %v1304_v19 = vmul.f32 %v1301_v15, %v1292_v17 }
 0xab6   : > { %1306 = vst.msk [vmem:[#allocation3 + $0x8] sm:$0xff] %vm1218_vm9, %v1304_v19 }
 0xab9   : > { %v1307_v41 = vld [vmem:[#allocation3] sm:$0xff] }
 0xaba   : > { %1309 = vst.msk [vmem:[%s1998_s13] sm:$0xff] %vm558_vm5, %v1307_v41 }
 0xabd   : > { %v1308_v45 = vld [vmem:[#allocation3 + $0x8] sm:$0xff] }
 0xabe   : > { %1310 = vst.msk [vmem:[%s1998_s13 + $0x8] sm:$0xff] %vm558_vm5, %v1308_v45 }
 0xabf PF: > { %s1466_s24 = sshll.u32 %s1825_s26, 2  ;;  %s1327_s25 = sshll.u32 %s1998_s13, 4  ;;  %s2315_s25 = int_to_ptr.vmem [resolvable:$true] %s1327_s25 }
 0xac0   : > { %s1324_s17 = sadd.s32 %s1466_s24, %s1979_s20  ;;  %s2408_s23 = sand.u32 1, %s1809_s22  }
 0xac1   : > { %s1467_s27 = sshll.u32 %s1324_s17, 7  ;;  %s2324_s11 = scalar_lea.sflag [#allocation5], %s2408_s23 }
 0xac2   : > { %s2320_s10 = scalar_lea.hbm %s2388_s6, %s1467_s27  ;;  %s1733_s29 = scalar_lea.vmem %s2315_s25, 256 }
 0xac3   : > { %p1734_p4 = scmp.ne.s32.totalorder %s2315_s25, %s1733_s29  ;;  %s1855_s26 = smov [#allocation4]  }
 0xac4   : > { %s1737_s13 = sshll.u32 %s1855_s26, 4  ;;  %s1738_s13 = int_to_ptr.vmem [resolvable:$false] %s1737_s13 }
 0xac5   : > { %p1735_p5 = pnand %p1734_p4, %p1954_p6  ;;  %s1739_s20 = scalar_lea.vmem %s1738_s13, 512 }
 0xac6   : > { %p1740_p9 = scmp.lt.s32.totalorder %s2315_s25, %s1738_s13  ;;  %p1741_p10 = scmp.lt.s32.totalorder %s1739_s20, %s1733_s29 }
 0xac7   : > { %p1736_p8 = pneg %p1735_p5 }
 0xac8   : > { %p1742_p11 = por %p1741_p10, %p1740_p9 }
 0xaca   : > { %p1743_p12 = pnand %p1742_p11, %p1736_p8 }
 0xacc   : > { %1746 = shalt.err (!%p1743_p12)
}
 0xacd   : > { %s1747_s18 = scalar_lea.hbm %s2320_s10, 256  ;;  %s1751_s8 = scalar_lea.hbm %s2388_s6, 1024 }
 0xace   : > { %p1748_p13 = scmp.ne.s32.totalorder %s2320_s10, %s1747_s18  ;;  %p1752_p2 = scmp.lt.s32.totalorder %s2320_s10, %s2388_s6 }
 0xacf   : > { %p1753_p3 = scmp.lt.s32.totalorder %s1751_s8, %s1747_s18 }
 0xad0   : > { %p1749_p0 = pnand %p1748_p13, %p1954_p6 }
 0xad1   : > { %p1754_p4 = por %p1753_p3, %p1752_p2 }
 0xad2   : > { %p1750_p1 = pneg %p1749_p0 }
 0xad4   : > { %p1755_p5 = pnand %p1754_p4, %p1750_p1 }
 0xad6   : > { %1758 = shalt.err (!%p1755_p5)
}
 0xad7   : > { %s1856_s24 = smov 128  }
 0xad8   : > { %1578 = dma.vmem_to_hbm [thread:$0]  (%p1954_p6), %s2315_s25, 256, %s2320_s10, %s2324_s11, %s1856_s24, %s1856_s24, %s1851_s14  }
 0xad9 PF: > { %p1584_p8 = scmp.ge.s32.totalorder %s1841_s30, 2  ;;  %s1342_s27 = sand.u32 1, %s1805_s21  }
 0xada   : > { %s1343_s28 = scalar_lea.sflag [#allocation5], %s1342_s27 }
 0xadb   : > { %p1581_p9 = pnand %p1584_p8, %p1961_p7 }
 0xadd   : > { %p1582_p10 = pneg %p1581_p9 }
 0xadf   : > { %1800 = dma.done.wait (%p1582_p10), %s1343_s28, 256  }
 0xae0   : > { %1802 = vsyncadd (%p1582_p10), %s1343_s28, 4294967040  ;;  %s19_s30 = sadd.s32 1, %s1841_s30   ;;  %s2410_s12 = sld [smem:[#allocation7_spill]] }
 0xae1   : > { %p16_p11 = scmp.ge.s32.totalorder %s19_s30, 10   ;;  %s2411_s23 = sld [smem:[#allocation15_spill]] }
 0xae2   : > { %s2412_s24 = sld [smem:[#allocation8_spill]]  ;;  %s2418_s21 = smov %s1809_s22 }
 0xae3   : > { %s2413_s25 = sld [smem:[#allocation9_spill]]  ;;  %18 = sbr.rel (!%p16_p11) target bundleno = 6 (0x6), region = 98 }
 0xae4   : > { %s2414_s26 = sld [smem:[#allocation10_spill]] }
 0xae5   : > { %s2415_s27 = sld [smem:[#allocation11_spill]] }
 0xae6   : > { %s2416_s28 = sld [smem:[#allocation12_spill]]  ;;  %s2419_s22 = smov %s2410_s12 }
 0xae7   : > { %s2417_s29 = sld [smem:[#allocation14_spill]] }
 0xae8   :  { %1348 = vsyncpa [#allocation5], 1 }
 0xae9   :  { %1350 = vsyncpa [#allocation5 + $0x1], 1 }

</bundles_post_ra>
